<compile_context>
chip_gen: v7x
topology: tpu7x:2x2x1
jax: 0.10.0
libtpu: 0.0.40
codegen_flags: <defaults>
</compile_context>

<pallas_src>
import functools

import jax
import jax.numpy as jnp
from jax.experimental import pallas as pl
from jax.experimental.pallas import tpu as pltpu


def _round_up(a, m):
    return ((a + m - 1) // m) * m


def _device_kind():
    try:
        return jax.devices()[0].device_kind.lower()
    except Exception:
        return ""


def _conduit_kernel(x_ref, w1a_ref, w2b_ref, b2_ref, out_ref, xa_ref, *,
                    n_cycles, matmul_dtype, ew_dtype):
    """One batch tile, all recycling cycles.  Feature-major layout.

    x_ref   : (D, TB)       f32            input tile (batch on lanes)
    w1a_ref : (D*Hd, D+1)   matmul_dtype   row i*Hd+h = net i unit h; col D = b1
    w2b_ref : (D, D*Hd)     matmul_dtype   block-diagonal second-layer weights
    b2_ref  : (D, 1)        f32
    out_ref : (D, TB)       f32            output of the final cycle
    xa_ref  : (D+1, TB)     matmul_dtype   scratch: x augmented with ones row
    """
    d, tb = x_ref.shape

    # Resident weights / hoisted broadcast (outside the unrolled cycle loop;
    # JAX does not CSE broadcast_in_dim).
    w1a = w1a_ref[...]
    w2b = w2b_ref[...]
    b2_b = jnp.broadcast_to(b2_ref[...], (d, tb))

    # Augmented-input scratch: row D is the constant ones row that folds the
    # layer-1 bias into the MXU contraction (K = D+1).  Written once per tile;
    # rows 0..D-1 are refreshed every cycle.
    xa_ref[...] = jnp.ones(xa_ref.shape, xa_ref.dtype)

    x = x_ref[...]
    # n_cycles is a small static int and each cycle depends on the previous
    # one, so a fully-unrolled Python loop is appropriate (n_cycles >= 1 is
    # asserted in the wrapper, so `out` is always defined).
    for _ in range(n_cycles):
        xa_ref[0:d, :] = x.astype(matmul_dtype)
        # Layer 1 of all D per-dimension nets as one MXU matmul, f32 accum;
        # the bias add rides along as the extra contraction column.
        h_pre = jnp.dot(w1a, xa_ref[...], preferred_element_type=jnp.float32)
        # tanh on the EUP: packed bf16 on v6e/v7x, f32 on v5e.
        h = jnp.tanh(h_pre.astype(ew_dtype))
        # Layer 2 as a block-diagonal matmul on the otherwise idle MXU
        # (K = D*Hd fills the systolic depth); replaces VPU mul + XLU reduce.
        out = jnp.dot(w2b, h.astype(matmul_dtype),
                      preferred_element_type=jnp.float32) + b2_b
        # Recycle in float32 to avoid drift across cycles.
        x = 0.5 * (x + out)

    out_ref[...] = out


def conduit_forward(x, packed_params, *, hidden_dim, n_cycles,
                    matmul_dtype=jnp.bfloat16, ew_dtype=None, tile_b=2048):
    """x: (B, D) float32. Returns (B, D) float32 (output of the last cycle)."""
    w1a, w2_blk, b2_col = packed_params
    B, D = x.shape
    DH = D * hidden_dim
    assert w1a.shape == (DH, D + 1)
    assert w2_blk.shape == (D, DH)
    assert b2_col.shape == (D, 1)
    assert n_cycles >= 1
    assert tile_b % 128 == 0

    kind = _device_kind()
    is_v5_or_older = not (("v6" in kind) or ("v7" in kind))
    is_v7 = "v7" in kind

    if ew_dtype is None:
        # bf16 VPU/EUP only exists on v6e/v7x; keep elementwise f32 elsewhere.
        ew_dtype = jnp.float32 if is_v5_or_older else jnp.bfloat16

    # Feature-major layout: batch on the lane axis -> lane-dense stores.
    # TODO(synk): for very large B the wrapper transposes become visible XLA
    # passes; keep callers in feature-major layout if that ever matters.
    x_t = x.astype(jnp.float32).T                        # (D, B)

    # Batch tiling: always pad to a multiple of 128 lanes (unmasked vst).
    b_pad = _round_up(B, 128)
    if b_pad <= tile_b:
        tb = b_pad
        if is_v7 and b_pad >= 256:
            # Guarantee >= 2 grid steps so the "parallel" axis can be sharded
            # across both v7x TensorCores.
            tb = _round_up(pl.cdiv(b_pad, 2), 128)
            b_pad = _round_up(b_pad, tb)
    else:
        tb = tile_b
        b_pad = _round_up(B, tb)
    if b_pad != B:
        x_t = jnp.pad(x_t, ((0, 0), (0, b_pad - B)))
    grid = (b_pad // tb,)

    w1a_m = w1a.astype(matmul_dtype)
    w2b_m = w2_blk.astype(matmul_dtype)
    b2_col = b2_col.astype(jnp.float32)

    kernel = functools.partial(
        _conduit_kernel, n_cycles=n_cycles,
        matmul_dtype=matmul_dtype, ew_dtype=ew_dtype)

    mm_i = jnp.dtype(matmul_dtype).itemsize
    ew_i = jnp.dtype(ew_dtype).itemsize
    # VMEM budget: double-buffered x/out tiles + resident weights + scratch +
    # per-cycle working set (h_pre f32, h ew, layer-2 operand copy).
    vmem_bytes = (
        2 * 2 * D * tb * 4
        + DH * (D + 1) * mm_i + D * DH * mm_i + D * 4
        + (D + 1) * tb * mm_i
        + DH * tb * (4 + ew_i + mm_i)
    )
    # TODO(synk): stream w1 per-net (pltpu.emit_pipeline) if DH*(D+1)*mm_i ever
    # exceeds ~24-32 MiB on v7x (~80-96 MiB on v5e/v6e); not needed here.
    vmem_cap = (48 << 20) if is_v7 else (100 << 20)
    vmem_limit = int(min(max(2 * vmem_bytes + (2 << 20), 16 << 20), vmem_cap))

    flops = int(n_cycles * b_pad * (2 * DH * (D + 1) + 2 * D * DH + 3 * D))
    transcendentals = int(n_cycles * b_pad * DH)
    bytes_accessed = int(2 * b_pad * D * 4
                         + DH * (D + 1) * mm_i + D * DH * mm_i + D * 4)

    out_t = pl.pallas_call(
        kernel,
        out_shape=jax.ShapeDtypeStruct((D, b_pad), jnp.float32),
        grid_spec=pltpu.PrefetchScalarGridSpec(
            num_scalar_prefetch=0,
            grid=grid,
            in_specs=[
                pl.BlockSpec((D, tb), lambda i: (0, i)),       # x tile (pipelined)
                pl.BlockSpec((DH, D + 1), lambda i: (0, 0)),   # w1|b1 (resident)
                pl.BlockSpec((D, DH), lambda i: (0, 0)),       # w2 block-diag
                pl.BlockSpec((D, 1), lambda i: (0, 0)),        # b2 (resident)
            ],
            out_specs=pl.BlockSpec((D, tb), lambda i: (0, i)),
            scratch_shapes=[pltpu.VMEM((D + 1, tb), matmul_dtype)],
        ),
        compiler_params=pltpu.CompilerParams(
            dimension_semantics=("parallel",),
            vmem_limit_bytes=vmem_limit,
        ),
        cost_estimate=pl.CostEstimate(
            flops=flops, transcendentals=transcendentals,
            bytes_accessed=bytes_accessed),
    )(x_t, w1a_m, w2b_m, b2_col)

    # Drop batch padding, return to (B, D) layout outside the kernel.
    return out_t[:, :B].T


def init_conduit_params(key, in_dim, hidden_dim):
    """Deterministic init mimicking PyTorch nn.Linear defaults.

    Per-network params (one net per output dim i in range(in_dim)):
      layer0: weight (hidden_dim, in_dim), bias (hidden_dim,)
      layer1: weight (1, hidden_dim),      bias (1,)
    Packed for the fused feature-major kernel as:
      w1a    (in_dim*hidden_dim, in_dim+1)  row i*Hd+h = net i unit h; col D = b1
      w2_blk (in_dim, in_dim*hidden_dim)    block-diagonal second layer
      b2_col (in_dim, 1)
    """
    D, Hd = in_dim, hidden_dim
    k1, k2, k3, k4 = jax.random.split(key, 4)

    bound1 = 1.0 / jnp.sqrt(jnp.float32(D))
    bound2 = 1.0 / jnp.sqrt(jnp.float32(Hd))

    w1_per_net = jax.random.uniform(k1, (D, Hd, D), jnp.float32, -bound1, bound1)
    b1_per_net = jax.random.uniform(k2, (D, Hd), jnp.float32, -bound1, bound1)
    w2_per_net = jax.random.uniform(k3, (D, Hd), jnp.float32, -bound2, bound2)
    b2_per_net = jax.random.uniform(k4, (D,), jnp.float32, -bound2, bound2)

    w1a = jnp.concatenate(
        [w1_per_net.reshape(D * Hd, D), b1_per_net.reshape(D * Hd, 1)], axis=1)
    w2_blk = (jnp.eye(D, dtype=jnp.float32)[:, :, None]
              * w2_per_net[None, :, :]).reshape(D, D * Hd)
    b2_col = b2_per_net.reshape(D, 1)

    per_net = (w1_per_net, b1_per_net, w2_per_net, b2_per_net)
    packed = (w1a, w2_blk, b2_col)
    return per_net, packed


def conduit_forward_ref(x, per_net_params, *, n_cycles):
    """Pure-JAX reference matching the PyTorch per-network formulation."""
    w1, b1, w2, b2 = per_net_params  # (D,Hd,D), (D,Hd), (D,Hd), (D,)
    out = jnp.zeros_like(x)
    for _ in range(n_cycles):
        # net i: tanh(x @ w1[i].T + b1[i]) @ w2[i] + b2[i]  -> scalar per row
        h = jnp.tanh(jnp.einsum("bd,ihd->bih", x, w1) + b1[None, :, :])
        out = jnp.einsum("bih,ih->bi", h, w2) + b2[None, :]
        x = 0.5 * (x + out)
    return out


if __name__ == "__main__":
    D = 16          # in_dim (= out_dim)
    Hd = 32         # hidden_dim
    n_cycles = 3
    # n_properties only affects the training loss, not forward.

    key = jax.random.PRNGKey(0)
    kx, kx2, kp = jax.random.split(key, 3)
    per_net, packed = init_conduit_params(kp, D, Hd)

    # --- small batch, all-float32 path: tight semantic check ---
    B = 8
    x = jax.random.normal(kx, (B, D), jnp.float32)
    out_f32 = conduit_forward(x, packed, hidden_dim=Hd, n_cycles=n_cycles,
                              matmul_dtype=jnp.float32, ew_dtype=jnp.float32)
    out_f32 = jax.block_until_ready(out_f32)
    ref = conduit_forward_ref(x, per_net, n_cycles=n_cycles)
    assert out_f32.shape == (B, D)
    err = jnp.max(jnp.abs(out_f32 - ref))
    assert jnp.allclose(out_f32, ref, atol=1e-4, rtol=1e-4), (
        f"f32 max abs err {err}")

    # --- ragged batch, multi-tile grid, bf16 MXU + chip-selected elementwise ---
    B2 = 200
    x2 = jax.random.normal(kx2, (B2, D), jnp.float32)
    out_fast = conduit_forward(x2, packed, hidden_dim=Hd, n_cycles=n_cycles,
                               matmul_dtype=jnp.bfloat16, tile_b=128)
    out_fast = jax.block_until_ready(out_fast)
    ref2 = conduit_forward_ref(x2, per_net, n_cycles=n_cycles)
    assert out_fast.shape == (B2, D)
    err2 = jnp.max(jnp.abs(out_fast - ref2))
    assert jnp.allclose(out_fast, ref2, atol=5e-2, rtol=5e-2), (
        f"bf16 max abs err {err2}")

    print("KERNEL_OK")
</pallas_src>

<mosaic_0001>
module attributes {stable_mosaic.version = 11 : i64} {
  func.func @_conduit_kernel(%arg0: i32, %arg1: memref<16x128xf32, #tpu.memory_space<vmem>>, %arg2: memref<512x17xf32, #tpu.memory_space<vmem>>, %arg3: memref<16x512xf32, #tpu.memory_space<vmem>>, %arg4: memref<16x1xf32, #tpu.memory_space<vmem>>, %arg5: memref<16x128xf32, #tpu.memory_space<vmem>>, %arg6: memref<17x128xf32, #tpu.memory_space<vmem>>) attributes {dimension_semantics = [#tpu.dimension_semantics<parallel>], iteration_bounds = array<i64: 1>, scalar_prefetch = 0 : i64, scratch_operands = 1 : i64, tpu.core_type = #tpu.core_type<tc>, window_params = [{transform_indices = @transform_0, window_bounds = array<i64: 16, 128>}, {pipeline_mode = #tpu.pipeline_mode<synchronous>, transform_indices = @transform_1, window_bounds = array<i64: 512, 17>}, {pipeline_mode = #tpu.pipeline_mode<synchronous>, transform_indices = @transform_2, window_bounds = array<i64: 16, 512>}, {pipeline_mode = #tpu.pipeline_mode<synchronous>, transform_indices = @transform_3, window_bounds = array<i64: 16, 1>}, {transform_indices = @transform_4, window_bounds = array<i64: 16, 128>}]} {
    %c0 = arith.constant 0 : index
    %c0_0 = arith.constant 0 : index
    %0 = vector.load %arg2[%c0, %c0_0] : memref<512x17xf32, #tpu.memory_space<vmem>>, vector<512x17xf32>
    %c0_1 = arith.constant 0 : index
    %c0_2 = arith.constant 0 : index
    %1 = vector.load %arg3[%c0_1, %c0_2] : memref<16x512xf32, #tpu.memory_space<vmem>>, vector<16x512xf32>
    %c0_3 = arith.constant 0 : index
    %c0_4 = arith.constant 0 : index
    %2 = vector.load %arg4[%c0_3, %c0_4] : memref<16x1xf32, #tpu.memory_space<vmem>>, vector<16x1xf32>
    %3 = vector.shape_cast %2 : vector<16x1xf32> to vector<16x1xf32>
    %4 = vector.broadcast %3 : vector<16x1xf32> to vector<16x128xf32>
    %cst = arith.constant 1.000000e+00 : f32
    %5 = vector.broadcast %cst : f32 to vector<17x128xf32>
    %c0_5 = arith.constant 0 : index
    %c0_6 = arith.constant 0 : index
    %6 = vector.load %arg6[%c0_5, %c0_6] : memref<17x128xf32, #tpu.memory_space<vmem>>, vector<17x128xf32>
    tpu.vector_store %arg6[%c0_5, %c0_6], %5 {strides = array<i32>} : memref<17x128xf32, #tpu.memory_space<vmem>>, vector<17x128xf32>,
    %c0_7 = arith.constant 0 : index
    %c0_8 = arith.constant 0 : index
    %7 = vector.load %arg1[%c0_7, %c0_8] : memref<16x128xf32, #tpu.memory_space<vmem>>, vector<16x128xf32>
    %c0_9 = arith.constant 0 : index
    %c0_10 = arith.constant 0 : index
    %8 = vector.load %arg6[%c0_9, %c0_10] : memref<17x128xf32, #tpu.memory_space<vmem>>, vector<16x128xf32>
    tpu.vector_store %arg6[%c0_9, %c0_10], %7 {strides = array<i32>} : memref<17x128xf32, #tpu.memory_space<vmem>>, vector<16x128xf32>,
    %c0_11 = arith.constant 0 : index
    %c0_12 = arith.constant 0 : index
    %9 = vector.load %arg6[%c0_11, %c0_12] : memref<17x128xf32, #tpu.memory_space<vmem>>, vector<17x128xf32>
    %cst_13 = arith.constant dense<0.000000e+00> : vector<512x128xf32>
    %10 = tpu.matmul %0, %9, %cst_13 {dimension_numbers = #tpu.dot_dimension_numbers<[1], [0], [0], [1], [0, 0, 1, 1], [], []>} : vector<512x17xf32>, vector<17x128xf32>, vector<512x128xf32> -> vector<512x128xf32>
    %11 = math.tanh %10 : vector<512x128xf32>
    %cst_14 = arith.constant dense<0.000000e+00> : vector<16x128xf32>
    %12 = tpu.matmul %1, %11, %cst_14 {dimension_numbers = #tpu.dot_dimension_numbers<[1], [0], [0], [1], [0, 0, 1, 1], [], []>} : vector<16x512xf32>, vector<512x128xf32>, vector<16x128xf32> -> vector<16x128xf32>
    %13 = arith.addf %12, %4 : vector<16x128xf32>
    %14 = arith.addf %7, %13 : vector<16x128xf32>
    %cst_15 = arith.constant 5.000000e-01 : f32
    %15 = vector.broadcast %cst_15 : f32 to vector<16x128xf32>
    %16 = arith.mulf %15, %14 : vector<16x128xf32>
    %c0_16 = arith.constant 0 : index
    %c0_17 = arith.constant 0 : index
    %17 = vector.load %arg6[%c0_16, %c0_17] : memref<17x128xf32, #tpu.memory_space<vmem>>, vector<16x128xf32>
    tpu.vector_store %arg6[%c0_16, %c0_17], %16 {strides = array<i32>} : memref<17x128xf32, #tpu.memory_space<vmem>>, vector<16x128xf32>,
    %c0_18 = arith.constant 0 : index
    %c0_19 = arith.constant 0 : index
    %18 = vector.load %arg6[%c0_18, %c0_19] : memref<17x128xf32, #tpu.memory_space<vmem>>, vector<17x128xf32>
    %cst_20 = arith.constant dense<0.000000e+00> : vector<512x128xf32>
    %19 = tpu.matmul %0, %18, %cst_20 {dimension_numbers = #tpu.dot_dimension_numbers<[1], [0], [0], [1], [0, 0, 1, 1], [], []>} : vector<512x17xf32>, vector<17x128xf32>, vector<512x128xf32> -> vector<512x128xf32>
    %20 = math.tanh %19 : vector<512x128xf32>
    %cst_21 = arith.constant dense<0.000000e+00> : vector<16x128xf32>
    %21 = tpu.matmul %1, %20, %cst_21 {dimension_numbers = #tpu.dot_dimension_numbers<[1], [0], [0], [1], [0, 0, 1, 1], [], []>} : vector<16x512xf32>, vector<512x128xf32>, vector<16x128xf32> -> vector<16x128xf32>
    %22 = arith.addf %21, %4 : vector<16x128xf32>
    %23 = arith.addf %16, %22 : vector<16x128xf32>
    %cst_22 = arith.constant 5.000000e-01 : f32
    %24 = vector.broadcast %cst_22 : f32 to vector<16x128xf32>
    %25 = arith.mulf %24, %23 : vector<16x128xf32>
    %c0_23 = arith.constant 0 : index
    %c0_24 = arith.constant 0 : index
    %26 = vector.load %arg6[%c0_23, %c0_24] : memref<17x128xf32, #tpu.memory_space<vmem>>, vector<16x128xf32>
    tpu.vector_store %arg6[%c0_23, %c0_24], %25 {strides = array<i32>} : memref<17x128xf32, #tpu.memory_space<vmem>>, vector<16x128xf32>,
    %c0_25 = arith.constant 0 : index
    %c0_26 = arith.constant 0 : index
    %27 = vector.load %arg6[%c0_25, %c0_26] : memref<17x128xf32, #tpu.memory_space<vmem>>, vector<17x128xf32>
    %cst_27 = arith.constant dense<0.000000e+00> : vector<512x128xf32>
    %28 = tpu.matmul %0, %27, %cst_27 {dimension_numbers = #tpu.dot_dimension_numbers<[1], [0], [0], [1], [0, 0, 1, 1], [], []>} : vector<512x17xf32>, vector<17x128xf32>, vector<512x128xf32> -> vector<512x128xf32>
    %29 = math.tanh %28 : vector<512x128xf32>
    %cst_28 = arith.constant dense<0.000000e+00> : vector<16x128xf32>
    %30 = tpu.matmul %1, %29, %cst_28 {dimension_numbers = #tpu.dot_dimension_numbers<[1], [0], [0], [1], [0, 0, 1, 1], [], []>} : vector<16x512xf32>, vector<512x128xf32>, vector<16x128xf32> -> vector<16x128xf32>
    %31 = arith.addf %30, %4 : vector<16x128xf32>
    %c0_29 = arith.constant 0 : index
    %c0_30 = arith.constant 0 : index
    %32 = vector.load %arg5[%c0_29, %c0_30] : memref<16x128xf32, #tpu.memory_space<vmem>>, vector<16x128xf32>
    tpu.vector_store %arg5[%c0_29, %c0_30], %31 {strides = array<i32>} : memref<16x128xf32, #tpu.memory_space<vmem>>, vector<16x128xf32>,
    return
  }
  func.func @transform_0(%arg0: i32) -> (i32, i32) {
    %c0_i32 = arith.constant 0 : i32
    %c0_i32_0 = arith.constant 0 : i32
    return %c0_i32, %arg0 : i32, i32
  }
  func.func @transform_1(%arg0: i32) -> (i32, i32) {
    %c0_i32 = arith.constant 0 : i32
    %c0_i32_0 = arith.constant 0 : i32
    %c0_i32_1 = arith.constant 0 : i32
    return %c0_i32, %c0_i32_0 : i32, i32
  }
  func.func @transform_2(%arg0: i32) -> (i32, i32) {
    %c0_i32 = arith.constant 0 : i32
    %c0_i32_0 = arith.constant 0 : i32
    %c0_i32_1 = arith.constant 0 : i32
    return %c0_i32, %c0_i32_0 : i32, i32
  }
  func.func @transform_3(%arg0: i32) -> (i32, i32) {
    %c0_i32 = arith.constant 0 : i32
    %c0_i32_0 = arith.constant 0 : i32
    %c0_i32_1 = arith.constant 0 : i32
    return %c0_i32, %c0_i32_0 : i32, i32
  }
  func.func @transform_4(%arg0: i32) -> (i32, i32) {
    %c0_i32 = arith.constant 0 : i32
    %c0_i32_0 = arith.constant 0 : i32
    return %c0_i32, %arg0 : i32, i32
  }
}

</mosaic_0001>

<bundles_post_ra>
// kernel: tpu_custom_call.1
= control target key start
LH: loop header
LB: loop body
LE: loop exit
PB: predicated region body
PF: predicated region fallthrough
CT: control target
= control target key end

     0   :  { %vm112_vm0 = vcmask 138240   ;;  %v3771_v4 = vmov 1.0   ;;  %vm305_vm1 = vcmask 1040384   ;;  %s5216_s0 = inlined_call_operand.vmem [shape: f32[16,128], index: 0, kind: input, shape index: {}]   ;;  %s5217_s1 = inlined_call_operand.vmem [shape: f32[512,17], index: 1, kind: input, shape index: {}]   ;;  %s5218_s2 = inlined_call_operand.vmem [shape: f32[16,512], index: 2, kind: input, shape index: {}]   ;;  %s5219_s3 = inlined_call_operand.vmem [shape: f32[16,1], index: 3, kind: input, shape index: {}]   ;;  %s5220_s4 = inlined_call_operand.hbm [shape: f32[16,128], index: 4, kind: output, shape index: {}]  }
   0x1   :  { %v3804_v0 = vld [vmem:[%s5216_s0] sm:$0xff]  ;;  %v3809_v1 = vld [vmem:[%s5216_s0 + $0x8] sm:$0xff]  ;;  %104 = vst [vmem:[#allocation2 + $0x10] sm:$0x1] %v3771_v4  ;;  %v3829_v7 = vld [vmem:[%s5217_s1 + $0x10] sm:$0xff] }
   0x2   :  { %v3814_v2 = vld [vmem:[%s5217_s1] sm:$0xff]  ;;  %v3078_v3 = vpack.c.bf16 %v3809_v1, %v3804_v0  ;;  %v3823_v6 = vld [vmem:[%s5217_s1 + $0x8] sm:$0xff]  ;;  %v3835_v8 = vld [vmem:[%s5217_s1 + $0x150] sm:$0xff] }
   0x3   :  { %2778 = vmatprep.mubr.msk.f32.mxu0 %vm112_vm0, %v3814_v2  ;;  %5271 = vst [vmem:[#allocation6_spill] sm:$0xff] %v3835_v8  ;;  %v3842_v9 = vld [vmem:[%s5217_s1 + $0x158] sm:$0xff]  ;;  %2841 = vmatprep.mubr.msk.f32.mxu1 %vm112_vm0, %v3835_v8  ;;  %v3851_v10 = vld [vmem:[%s5217_s1 + $0x160] sm:$0xff]  ;;  %v3872_v13 = vld [vmem:[%s5217_s1 + $0x168] sm:$0xff] }
   0x4   :  { %3079 = vmatprep.subr.bf16.mxu0 %v3078_v3  ;;  %3282 = vmatprep.subr.bf16.mxu1 %v3078_v3  ;;  %5272 = vst [vmem:[#allocation7_spill] sm:$0xff] %v3842_v9  ;;  %5273 = vst [vmem:[#allocation8_spill] sm:$0xff] %v3851_v10  ;;  %v3858_v11 = vld [vmem:[%s5217_s1 + $0x18] sm:$0xff]  ;;  %v3865_v12 = vld [vmem:[%s5217_s1 + $0x20] sm:$0xff] }
   0x5   :  { %3081 = vmatpush3.bf16.msra.mxu0 %v3078_v3  ;;  %3284 = vmatpush3.bf16.msra.mxu1 %v3078_v3  ;;  %5274 = vst [vmem:[#allocation9_spill] sm:$0xff] %v3872_v13  ;;  %v3877_v14 = vld [vmem:[%s5217_s1 + $0x170] sm:$0xff]  ;;  %v3886_v15 = vld [vmem:[%s5217_s1 + $0x28] sm:$0xff]  ;;  %v3900_v17 = vld [vmem:[%s5217_s1 + $0x178] sm:$0xff] }
   0x6   :  { %5275 = vst [vmem:[#allocation10_spill] sm:$0xff] %v3877_v14  ;;  %v3893_v16 = vld [vmem:[%s5217_s1 + $0x30] sm:$0xff]  ;;  %5276 = vst [vmem:[#allocation11_spill] sm:$0xff] %v3900_v17  ;;  %v3905_v18 = vld [vmem:[%s5217_s1 + $0x180] sm:$0xff] }
   0x7   :  { %5277 = vst [vmem:[#allocation12_spill] sm:$0xff] %v3905_v18  ;;  %v3914_v19 = vld [vmem:[%s5217_s1 + $0x38] sm:$0xff]  ;;  %v3921_v20 = vld [vmem:[%s5217_s1 + $0x40] sm:$0xff]  ;;  %v3928_v21 = vld [vmem:[%s5217_s1 + $0x188] sm:$0xff] }
   0x8   :  { %v111_v5 = vld [vmem:[#allocation2 + $0x10] sm:$0x1]  ;;  %5278 = vst [vmem:[#allocation13_spill] sm:$0xff] %v3928_v21 }
   0x9   :  { %2776 = vmatprep.subr.msk.mxu0 %vm305_vm1, %v111_v5  ;;  %3283 = vmatprep.subr.msk.mxu1 %vm305_vm1, %v111_v5  ;;  %v3933_v22 = vld [vmem:[%s5217_s1 + $0x190] sm:$0xff] }
   0xa   :  { %2777 = vmatpush3.msk.msra.mxu0 %vm305_vm1, %v111_v5  ;;  %3285 = vmatpush3.msk.msra.mxu1 %vm305_vm1, %v111_v5  ;;  %5279 = vst [vmem:[#allocation14_spill] sm:$0xff] %v3933_v22 }
   0xb   :  { %2779 = vmatmul.mubr.msk.f32.vlgmr.msra.gmra.mrb[0].mxu0 %vm112_vm0, %v3823_v6  ;;  %2842 = vmatmul.mubr.msk.f32.vlgmr.msra.gmra.mrb[0].mxu1 %vm112_vm0, %v3842_v9 }
   0xc   :  { %2781 = vmatprep.mubr.msk.f32.mxu0 %vm112_vm0, %v3829_v7  ;;  %2844 = vmatprep.mubr.msk.f32.mxu1 %vm112_vm0, %v3851_v10 }
   0xf   :  { %2782 = vmatmul.mubr.msk.f32.gmra.mrb[2].mxu0 %vm112_vm0, %v3858_v11  ;;  %2845 = vmatmul.mubr.msk.f32.gmra.mrb[2].mxu1 %vm112_vm0, %v3872_v13 }
  0x10   :  { %2784 = vmatprep.mubr.msk.f32.mxu0 %vm112_vm0, %v3865_v12  ;;  %2847 = vmatprep.mubr.msk.f32.mxu1 %vm112_vm0, %v3877_v14 }
  0x13   :  { %2785 = vmatmul.mubr.msk.f32.gmra.mrb[4].mxu0 %vm112_vm0, %v3886_v15  ;;  %2848 = vmatmul.mubr.msk.f32.gmra.mrb[4].mxu1 %vm112_vm0, %v3900_v17 }
  0x14   :  { %2787 = vmatprep.mubr.msk.f32.mxu0 %vm112_vm0, %v3893_v16  ;;  %2850 = vmatprep.mubr.msk.f32.mxu1 %vm112_vm0, %v3905_v18 }
  0x15   :  { %9 = vsyncpa [#allocation4], 0  ;;  %v3942_v23 = vld [vmem:[%s5217_s1 + $0x48] sm:$0xff]  ;;  %v3949_v24 = vld [vmem:[%s5217_s1 + $0x50] sm:$0xff]  ;;  %s3773_s5 = smov [#allocation3]  }
  0x16   :  { %v3956_v25 = vld [vmem:[%s5217_s1 + $0x198] sm:$0xff]  ;;  %v3961_v26 = vld [vmem:[%s5217_s1 + $0x1a0] sm:$0xff]  ;;  %v3984_v29 = vld [vmem:[%s5217_s1 + $0x1a8] sm:$0xff]  ;;  %s2137_s6 = sshll.u32 %s3773_s5, 4  ;;  %s2138_s6 = int_to_ptr.vmem [resolvable:$true] %s2137_s6 }
  0x17   :  { %2788 = vmatmul.mubr.msk.f32.gmra.mrb[6].mxu0 %vm112_vm0, %v3914_v19  ;;  %2851 = vmatmul.mubr.msk.f32.gmra.mrb[6].mxu1 %vm112_vm0, %v3928_v21  ;;  %5280 = vst [vmem:[#allocation15_spill] sm:$0xff] %v3956_v25  ;;  %5281 = vst [vmem:[#allocation16_spill] sm:$0xff] %v3961_v26  ;;  %v3970_v27 = vld [vmem:[%s5217_s1 + $0x58] sm:$0xff]  ;;  %v3977_v28 = vld [vmem:[%s5217_s1 + $0x60] sm:$0xff]  ;;  %p3752_p1 = scmp.lt.s32.totalorder %s2138_s6, %s2138_s6 }
  0x18   :  { %2790 = vmatprep.mubr.msk.f32.mxu0 %vm112_vm0, %v3921_v20  ;;  %2853 = vmatprep.mubr.msk.f32.mxu1 %vm112_vm0, %v3933_v22  ;;  %5282 = vst [vmem:[#allocation17_spill] sm:$0xff] %v3984_v29  ;;  %v3989_v30 = vld [vmem:[%s5217_s1 + $0x1b0] sm:$0xff]  ;;  %v3998_v31 = vld [vmem:[%s5217_s1 + $0x68] sm:$0xff]  ;;  %v4012_v33 = vld [vmem:[%s5217_s1 + $0x1b8] sm:$0xff] }
  0x19   :  { %5283 = vst [vmem:[#allocation18_spill] sm:$0xff] %v3989_v30  ;;  %v4005_v32 = vld [vmem:[%s5217_s1 + $0x70] sm:$0xff]  ;;  %5284 = vst [vmem:[#allocation19_spill] sm:$0xff] %v4012_v33  ;;  %v4017_v34 = vld [vmem:[%s5217_s1 + $0x1c0] sm:$0xff] }
  0x1a   :  { %5285 = vst [vmem:[#allocation20_spill] sm:$0xff] %v4017_v34  ;;  %v4026_v35 = vld [vmem:[%s5217_s1 + $0x78] sm:$0xff]  ;;  %v4033_v36 = vld [vmem:[%s5217_s1 + $0x80] sm:$0xff]  ;;  %v4040_v37 = vld [vmem:[%s5217_s1 + $0x1c8] sm:$0xff] }
  0x1b   :  { %2791 = vmatmul.mubr.msk.f32.gmra.mrb[8].mxu0 %vm112_vm0, %v3942_v23  ;;  %2854 = vmatmul.mubr.msk.f32.gmra.mrb[8].mxu1 %vm112_vm0, %v3956_v25  ;;  %5286 = vst [vmem:[#allocation21_spill] sm:$0xff] %v4026_v35  ;;  %5287 = vst [vmem:[#allocation22_spill] sm:$0xff] %v4033_v36  ;;  %v4045_v38 = vld [vmem:[%s5217_s1 + $0x1d0] sm:$0xff]  ;;  %v4054_v39 = vld [vmem:[%s5217_s1 + $0x88] sm:$0xff] }
  0x1c   :  { %2793 = vmatprep.mubr.msk.f32.mxu0 %vm112_vm0, %v3949_v24  ;;  %2856 = vmatprep.mubr.msk.f32.mxu1 %vm112_vm0, %v3961_v26  ;;  %5288 = vst [vmem:[#allocation23_spill] sm:$0xff] %v4040_v37  ;;  %5289 = vst [vmem:[#allocation24_spill] sm:$0xff] %v4045_v38  ;;  %v4061_v40 = vld [vmem:[%s5217_s1 + $0x90] sm:$0xff]  ;;  %v4068_v41 = vld [vmem:[%s5217_s1 + $0x1d8] sm:$0xff] }
  0x1d   :  { %5290 = vst [vmem:[#allocation25_spill] sm:$0xff] %v4054_v39  ;;  %5291 = vst [vmem:[#allocation26_spill] sm:$0xff] %v4061_v40  ;;  %v4073_v42 = vld [vmem:[%s5217_s1 + $0x1e0] sm:$0xff]  ;;  %v4082_v43 = vld [vmem:[%s5217_s1 + $0x98] sm:$0xff] }
  0x1e   :  { %5292 = vst [vmem:[#allocation27_spill] sm:$0xff] %v4068_v41  ;;  %5293 = vst [vmem:[#allocation28_spill] sm:$0xff] %v4073_v42  ;;  %v4089_v44 = vld [vmem:[%s5217_s1 + $0xa0] sm:$0xff]  ;;  %v4096_v45 = vld [vmem:[%s5217_s1 + $0x1e8] sm:$0xff] }
  0x1f   :  { %2794 = vmatmul.mubr.msk.f32.gmra.mrb[10].mxu0 %vm112_vm0, %v3970_v27  ;;  %2857 = vmatmul.mubr.msk.f32.gmra.mrb[10].mxu1 %vm112_vm0, %v3984_v29  ;;  %5294 = vst [vmem:[#allocation29_spill] sm:$0xff] %v4082_v43  ;;  %5295 = vst [vmem:[#allocation30_spill] sm:$0xff] %v4089_v44  ;;  %v4101_v46 = vld [vmem:[%s5217_s1 + $0x1f0] sm:$0xff]  ;;  %v4110_v47 = vld [vmem:[%s5217_s1 + $0xa8] sm:$0xff] }
  0x20   :  { %2796 = vmatprep.mubr.msk.f32.mxu0 %vm112_vm0, %v3977_v28  ;;  %2859 = vmatprep.mubr.msk.f32.mxu1 %vm112_vm0, %v3989_v30  ;;  %5296 = vst [vmem:[#allocation31_spill] sm:$0xff] %v4096_v45  ;;  %5297 = vst [vmem:[#allocation32_spill] sm:$0xff] %v4101_v46  ;;  %v4117_v48 = vld [vmem:[%s5217_s1 + $0xb0] sm:$0xff]  ;;  %v4124_v49 = vld [vmem:[%s5217_s1 + $0x1f8] sm:$0xff] }
  0x21   :  { %5298 = vst [vmem:[#allocation33_spill] sm:$0xff] %v4110_v47  ;;  %5299 = vst [vmem:[#allocation34_spill] sm:$0xff] %v4117_v48  ;;  %v4133_v50 = vld [vmem:[%s5217_s1 + $0xb8] sm:$0xff]  ;;  %v4140_v51 = vld [vmem:[%s5217_s1 + $0xc0] sm:$0xff] }
  0x22   :  { %5300 = vst [vmem:[#allocation35_spill] sm:$0xff] %v4124_v49  ;;  %5301 = vst [vmem:[#allocation36_spill] sm:$0xff] %v4133_v50  ;;  %v4149_v52 = vld [vmem:[%s5217_s1 + $0xc8] sm:$0xff]  ;;  %v4154_v53 = vld [vmem:[%s5217_s1 + $0xd0] sm:$0xff] }
  0x23   :  { %2797 = vmatmul.mubr.msk.f32.gmra.mrb[12].mxu0 %vm112_vm0, %v3998_v31  ;;  %2860 = vmatmul.mubr.msk.f32.gmra.mrb[12].mxu1 %vm112_vm0, %v4012_v33  ;;  %5302 = vst [vmem:[#allocation37_spill] sm:$0xff] %v4140_v51  ;;  %5303 = vst [vmem:[#allocation38_spill] sm:$0xff] %v4149_v52  ;;  %v4163_v54 = vld [vmem:[%s5217_s1 + $0xd8] sm:$0xff]  ;;  %v4168_v55 = vld [vmem:[%s5217_s1 + $0xe0] sm:$0xff] }
  0x24   :  { %2799 = vmatprep.mubr.msk.f32.mxu0 %vm112_vm0, %v4005_v32  ;;  %2862 = vmatprep.mubr.msk.f32.mxu1 %vm112_vm0, %v4017_v34  ;;  %5304 = vst [vmem:[#allocation39_spill] sm:$0xff] %v4154_v53  ;;  %5305 = vst [vmem:[#allocation40_spill] sm:$0xff] %v4163_v54  ;;  %v4177_v56 = vld [vmem:[%s5217_s1 + $0xe8] sm:$0xff]  ;;  %v4182_v57 = vld [vmem:[%s5217_s1 + $0xf0] sm:$0xff] }
  0x25   :  { %5306 = vst [vmem:[#allocation41_spill] sm:$0xff] %v4168_v55  ;;  %5307 = vst [vmem:[#allocation42_spill] sm:$0xff] %v4177_v56  ;;  %v4191_v58 = vld [vmem:[%s5217_s1 + $0xf8] sm:$0xff]  ;;  %v4196_v59 = vld [vmem:[%s5217_s1 + $0x100] sm:$0xff] }
  0x26   :  { %5308 = vst [vmem:[#allocation43_spill] sm:$0xff] %v4182_v57  ;;  %5309 = vst [vmem:[#allocation44_spill] sm:$0xff] %v4191_v58  ;;  %v4205_v60 = vld [vmem:[%s5217_s1 + $0x108] sm:$0xff]  ;;  %v4210_v61 = vld [vmem:[%s5217_s1 + $0x110] sm:$0xff] }
  0x27   :  { %2800 = vmatmul.mubr.msk.f32.gmra.mrb[14].mxu0 %vm112_vm0, %v4026_v35  ;;  %2863 = vmatmul.mubr.msk.f32.gmra.mrb[14].mxu1 %vm112_vm0, %v4040_v37  ;;  %5310 = vst [vmem:[#allocation45_spill] sm:$0xff] %v4196_v59  ;;  %5311 = vst [vmem:[#allocation46_spill] sm:$0xff] %v4205_v60  ;;  %v4219_v62 = vld [vmem:[%s5217_s1 + $0x118] sm:$0xff]  ;;  %v4224_v63 = vld [vmem:[%s5217_s1 + $0x120] sm:$0xff] }
  0x28   :  { %2802 = vmatprep.mubr.msk.f32.mxu0 %vm112_vm0, %v4033_v36  ;;  %2865 = vmatprep.mubr.msk.f32.mxu1 %vm112_vm0, %v4045_v38  ;;  %5312 = vst [vmem:[#allocation47_spill] sm:$0xff] %v4210_v61  ;;  %5313 = vst [vmem:[#allocation48_spill] sm:$0xff] %v4219_v62  ;;  %v4233_v3 = vld [vmem:[%s5217_s1 + $0x128] sm:$0xff]  ;;  %v4238_v4 = vld [vmem:[%s5217_s1 + $0x130] sm:$0xff] }
  0x29   :  { %5314 = vst [vmem:[#allocation49_spill] sm:$0xff] %v4224_v63  ;;  %5315 = vst [vmem:[#allocation50_spill] sm:$0xff] %v4233_v3  ;;  %v4247_v5 = vld [vmem:[%s5217_s1 + $0x138] sm:$0xff]  ;;  %v91_v38 = vld [vmem:[%s5219_s3 + $0x8] sm:$0xff] }
  0x2a   :  { %5316 = vst [vmem:[#allocation51_spill] sm:$0xff] %v4238_v4  ;;  %5317 = vst [vmem:[#allocation52_spill] sm:$0xff] %v4247_v5 }
  0x2b   :  { %2803 = vmatmul.mubr.msk.f32.gmra.mrb[16].mxu0 %vm112_vm0, %v4054_v39  ;;  %2866 = vmatmul.mubr.msk.f32.gmra.mrb[16].mxu1 %vm112_vm0, %v4068_v41  ;;  %v3772_v41 = vmov 0  }
  0x2c   :  { %2805 = vmatprep.mubr.msk.f32.mxu0 %vm112_vm0, %v4061_v40  ;;  %2868 = vmatprep.mubr.msk.f32.mxu1 %vm112_vm0, %v4073_v42  ;;  %v90_v42 = vld [vmem:[%s5219_s3] sm:$0xff] }
  0x2d   :  { %3291 = vset.pattern.permute.xlu0 %v3772_v41 }
  0x2e   :  { %94 = vperm.xlu0 %3291, %v90_v42  }
  0x2f   :  { %2806 = vmatmul.mubr.msk.f32.gmra.mrb[18].mxu0 %vm112_vm0, %v4082_v43  ;;  %2869 = vmatmul.mubr.msk.f32.gmra.mrb[18].mxu1 %vm112_vm0, %v4096_v45  ;;  %v4268_v45 = vld [vmem:[%s5218_s2 + $0x8] sm:$0xff] }
  0x30   :  { %2808 = vmatprep.mubr.msk.f32.mxu0 %vm112_vm0, %v4089_v44  ;;  %2871 = vmatprep.mubr.msk.f32.mxu1 %vm112_vm0, %v4101_v46  ;;  %v4261_v46 = vld [vmem:[%s5217_s1 + $0x148] sm:$0xff]  ;;  %5320 = vst [vmem:[#allocation55_spill] sm:$0xff] %v4268_v45 }
  0x31   :  { %5319 = vst [vmem:[#allocation54_spill] sm:$0xff] %v4261_v46 }
  0x32   :  { %99 = vperm.xlu0 %3291, %v91_v38  }
  0x33   :  { %2809 = vmatmul.mubr.msk.f32.gmra.mrb[20].mxu0 %vm112_vm0, %v4110_v47  ;;  %2872 = vmatmul.mubr.msk.f32.gmra.mrb[20].mxu1 %vm112_vm0, %v4124_v49  ;;  %v4252_v49 = vld [vmem:[%s5217_s1 + $0x140] sm:$0xff] }
  0x34   :  { %2811 = vmatprep.mubr.msk.f32.mxu0 %vm112_vm0, %v4117_v48  ;;  %5318 = vst [vmem:[#allocation53_spill] sm:$0xff] %v4252_v49  ;;  %822 = vmatprep.mubr.f32.mxu1 %v4268_v45 }
  0x37   :  { %2812 = vmatmul.mubr.msk.f32.gmra.mrb[22].mxu0 %vm112_vm0, %v4133_v50 }
  0x38   :  { %2814 = vmatprep.mubr.msk.f32.mxu0 %vm112_vm0, %v4140_v51 }
  0x3b   :  { %2815 = vmatmul.mubr.msk.f32.gmra.mrb[24].mxu0 %vm112_vm0, %v4149_v52 }
  0x3c   :  { %2817 = vmatprep.mubr.msk.f32.mxu0 %vm112_vm0, %v4154_v53 }
  0x3f   :  { %2818 = vmatmul.mubr.msk.f32.gmra.mrb[26].mxu0 %vm112_vm0, %v4163_v54 }
  0x40   :  { %2820 = vmatprep.mubr.msk.f32.mxu0 %vm112_vm0, %v4168_v55 }
  0x43   :  { %2821 = vmatmul.mubr.msk.f32.gmra.mrb[28].mxu0 %vm112_vm0, %v4177_v56 }
  0x44   :  { %2823 = vmatprep.mubr.msk.f32.mxu0 %vm112_vm0, %v4182_v57 }
  0x47   :  { %2824 = vmatmul.mubr.msk.f32.gmra.mrb[30].mxu0 %vm112_vm0, %v4191_v58 }
  0x48   :  { %2826 = vmatprep.mubr.msk.f32.mxu0 %vm112_vm0, %v4196_v59 }
  0x4b   :  { %2827 = vmatmul.mubr.msk.f32.gmra.mrb[32].mxu0 %vm112_vm0, %v4205_v60 }
  0x4c   :  { %2829 = vmatprep.mubr.msk.f32.mxu0 %vm112_vm0, %v4210_v61 }
  0x4f   :  { %2830 = vmatmul.mubr.msk.f32.gmra.mrb[34].mxu0 %vm112_vm0, %v4219_v62 }
  0x50   :  { %2832 = vmatprep.mubr.msk.f32.mxu0 %vm112_vm0, %v4224_v63 }
  0x53   :  { %2833 = vmatmul.mubr.msk.f32.gmra.mrb[36].mxu0 %vm112_vm0, %v4233_v3 }
  0x54   :  { %2835 = vmatprep.mubr.msk.f32.mxu0 %vm112_vm0, %v4238_v4 }
  0x57   :  { %2836 = vmatmul.mubr.msk.f32.gmra.mrb[38].mxu0 %vm112_vm0, %v4247_v5 }
  0x58   :  { %2838 = vmatprep.mubr.msk.f32.mxu0 %vm112_vm0, %v4252_v49 }
  0x5b   :  { %2839 = vmatmul.mubr.msk.f32.gmra.mrb[40].mxu0 %vm112_vm0, %v4261_v46 }
  0x5c   :  { %1433 = vmatprep.mubr.f32.mxu0 %v4268_v45 }
  0xde   :  { %v2780_v37 = vpop.f32.mrb[0].mxu0  ;;  %v2843_v33 = vpop.f32.mrb[0].mxu1 }
  0xdf   :  { %3292 = vtanh.f32 %v2780_v37  ;;  %v375_v34 = vpop.f32.mrb[1].mxu0  ;;  %v585_v30 = vpop.f32.mrb[1].mxu1 }
  0xe0   :  { %3294 = vtanh.f32 %v375_v34 }
  0xe1   :  { %3296 = vtanh.f32 %v2843_v33 }
  0xe2   :  { %v2783_v45 = vpop.f32.mrb[2].mxu0  ;;  %3298 = vtanh.f32 %v585_v30  ;;  %v2846_v26 = vpop.f32.mrb[2].mxu1 }
  0xe3   :  { %3300 = vtanh.f32 %v2783_v45  ;;  %v385_v29 = vpop.f32.mrb[3].mxu0  ;;  %v595_v41 = vpop.f32.mrb[3].mxu1 }
  0xe4   :  { %3302 = vtanh.f32 %v385_v29 }
  0xe5   :  { %3304 = vtanh.f32 %v2846_v26 }
  0xe6   :  { %v2786_v42 = vpop.f32.mrb[4].mxu0  ;;  %3306 = vtanh.f32 %v595_v41  ;;  %v2849_v38 = vpop.f32.mrb[4].mxu1 }
  0xe7   :  { %3308 = vtanh.f32 %v2786_v42  ;;  %v395_v25 = vpop.f32.mrb[5].mxu0  ;;  %v605_v37 = vpop.f32.mrb[5].mxu1 }
  0xe8   :  { %3310 = vtanh.f32 %v395_v25 }
  0xe9   :  { %v4278_v22 = vpop.eup %3292  ;;  %3312 = vtanh.f32 %v2849_v38 }
  0xea   :  { %v4280_v34 = vpop.eup %3294  ;;  %v2789_v33 = vpop.f32.mrb[6].mxu0  ;;  %3314 = vtanh.f32 %v605_v37 }
  0xeb   :  { %v4282_v30 = vpop.eup %3296  ;;  %3316 = vtanh.f32 %v2789_v33  ;;  %v405_v29 = vpop.f32.mrb[7].mxu0  ;;  %v5321_v38 = vpack.c.bf16 %v4278_v22, %v4280_v34 }
  0xec   :  { %v2852_v45 = vpop.f32.mrb[6].mxu1  ;;  %v4286_v41 = vpop.eup %3298  ;;  %3318 = vtanh.f32 %v405_v29 }
  0xed   :  { %v615_v25 = vpop.f32.mrb[7].mxu1  ;;  %v4288_v42 = vpop.eup %3300  ;;  %3320 = vtanh.f32 %v2852_v45 }
  0xee   :  { %v4292_v21 = vpop.eup %3302  ;;  %v2792_v37 = vpop.f32.mrb[8].mxu0  ;;  %3322 = vtanh.f32 %v615_v25 }
  0xef   :  { %v4294_v33 = vpop.eup %3304  ;;  %3324 = vtanh.f32 %v2792_v37  ;;  %v415_v18 = vpop.f32.mrb[9].mxu0  ;;  %v5322_v35 = vpack.c.bf16 %v4288_v42, %v4292_v21 }
  0xf0   :  { %v2855_v17 = vpop.f32.mrb[8].mxu1  ;;  %v4298_v29 = vpop.eup %3306  ;;  %3326 = vtanh.f32 %v415_v18 }
  0xf1   :  { %v625_v14 = vpop.f32.mrb[9].mxu1  ;;  %v4300_v45 = vpop.eup %3308  ;;  %3328 = vtanh.f32 %v2855_v17 }
  0xf2   :  { %v4304_v13 = vpop.eup %3310  ;;  %v2795_v25 = vpop.f32.mrb[10].mxu0  ;;  %3330 = vtanh.f32 %v625_v14 }
  0xf3   :  { %v4306_v37 = vpop.eup %3312  ;;  %3332 = vtanh.f32 %v2795_v25  ;;  %v425_v10 = vpop.f32.mrb[11].mxu0 }
  0xf4   :  { %v2858_v9 = vpop.f32.mrb[10].mxu1  ;;  %v4310_v18 = vpop.eup %3314  ;;  %3334 = vtanh.f32 %v425_v10 }
  0xf5   :  { %v635_v8 = vpop.f32.mrb[11].mxu1  ;;  %v4312_v17 = vpop.eup %3316  ;;  %3336 = vtanh.f32 %v2858_v9 }
  0xf6   :  { %v4316_v46 = vpop.eup %3318  ;;  %v2798_v14 = vpop.f32.mrb[12].mxu0  ;;  %3338 = vtanh.f32 %v635_v8 }
  0xf7   :  { %v4318_v25 = vpop.eup %3320  ;;  %3340 = vtanh.f32 %v2798_v14  ;;  %v435_v49 = vpop.f32.mrb[13].mxu0 }
  0xf8   :  { %v2861_v5 = vpop.f32.mrb[12].mxu1  ;;  %v4322_v10 = vpop.eup %3322  ;;  %3342 = vtanh.f32 %v435_v49 }
  0xf9   :  { %v645_v4 = vpop.f32.mrb[13].mxu1  ;;  %v4324_v9 = vpop.eup %3324  ;;  %3344 = vtanh.f32 %v2861_v5 }
  0xfa   :  { %v4328_v3 = vpop.eup %3326  ;;  %v2801_v8 = vpop.f32.mrb[14].mxu0  ;;  %3346 = vtanh.f32 %v645_v4 }
  0xfb   :  { %v4330_v14 = vpop.eup %3328  ;;  %3348 = vtanh.f32 %v2801_v8  ;;  %v445_v63 = vpop.f32.mrb[15].mxu0 }
  0xfc   :  { %v2864_v62 = vpop.f32.mrb[14].mxu1  ;;  %v4334_v49 = vpop.eup %3330  ;;  %3350 = vtanh.f32 %v445_v63 }
  0xfd   :  { %v655_v61 = vpop.f32.mrb[15].mxu1  ;;  %v4336_v5 = vpop.eup %3332  ;;  %3352 = vtanh.f32 %v2864_v62 }
  0xfe   :  { %v4340_v60 = vpop.eup %3334  ;;  %v2804_v4 = vpop.f32.mrb[16].mxu0  ;;  %3354 = vtanh.f32 %v655_v61 }
  0xff   :  { %v4342_v8 = vpop.eup %3336  ;;  %3356 = vtanh.f32 %v2804_v4  ;;  %v455_v59 = vpop.f32.mrb[17].mxu0 }
 0x100   :  { %v2867_v58 = vpop.f32.mrb[16].mxu1  ;;  %v4346_v63 = vpop.eup %3338  ;;  %3358 = vtanh.f32 %v455_v59 }
 0x101   :  { %v665_v57 = vpop.f32.mrb[17].mxu1  ;;  %v4348_v62 = vpop.eup %3340  ;;  %3360 = vtanh.f32 %v2867_v58 }
 0x102   :  { %v4352_v56 = vpop.eup %3342  ;;  %v2807_v61 = vpop.f32.mrb[18].mxu0  ;;  %3362 = vtanh.f32 %v665_v57 }
 0x103   :  { %v4354_v4 = vpop.eup %3344  ;;  %3364 = vtanh.f32 %v2807_v61  ;;  %v465_v55 = vpop.f32.mrb[19].mxu0 }
 0x104   :  { %v2870_v54 = vpop.f32.mrb[18].mxu1  ;;  %v4358_v59 = vpop.eup %3346  ;;  %3366 = vtanh.f32 %v465_v55 }
 0x105   :  { %v675_v53 = vpop.f32.mrb[19].mxu1  ;;  %v4360_v58 = vpop.eup %3348  ;;  %3368 = vtanh.f32 %v2870_v54 }
 0x106   :  { %v4364_v52 = vpop.eup %3350  ;;  %v2810_v57 = vpop.f32.mrb[20].mxu0  ;;  %3370 = vtanh.f32 %v675_v53 }
 0x107   :  { %v4366_v61 = vpop.eup %3352  ;;  %3372 = vtanh.f32 %v2810_v57  ;;  %v475_v51 = vpop.f32.mrb[21].mxu0 }
 0x108   :  { %v2873_v50 = vpop.f32.mrb[20].mxu1  ;;  %v4370_v55 = vpop.eup %3354  ;;  %3374 = vtanh.f32 %v475_v51 }
 0x109   :  { %v685_v48 = vpop.f32.mrb[21].mxu1  ;;  %v3357_v54 = vpop.eup %3356  ;;  %3376 = vtanh.f32 %v2873_v50 }
 0x10a   :  { %v3359_v47 = vpop.eup %3358  ;;  %v2813_v44 = vpop.f32.mrb[22].mxu0  ;;  %3378 = vtanh.f32 %v685_v48 }
 0x10b   :  { %v4374_v53 = vpop.eup %3360  ;;  %3380 = vtanh.f32 %v2813_v44  ;;  %v485_v57 = vpop.f32.mrb[23].mxu0  ;;  %v3082_v43 = vpack.c.bf16 %v3357_v54, %v3359_v47 }
 0x10c   :  { %v4376_v40 = vpop.eup %3362  ;;  %3382 = vtanh.f32 %v485_v57 }
 0x10d   :  { %v3365_v26 = vpop.eup %3364  ;;  %3083 = vmatprep.subr.bf16.mxu1 %v3082_v43  ;;  %v5323_v43 = vpack.c.bf16 %v4300_v45, %v4304_v13 }
 0x10e   :  { %v3367_v50 = vpop.eup %3366  ;;  %v2816_v39 = vpop.f32.mrb[24].mxu0  ;;  %3085 = vmatpush3.bf16.msra.mxu1 %v5321_v38 }
 0x10f   :  { %v4383_v48 = vpop.eup %3368  ;;  %3384 = vtanh.f32 %v2816_v39  ;;  %v495_v44 = vpop.f32.mrb[25].mxu0  ;;  %v3086_v36 = vpack.c.bf16 %v3365_v26, %v3367_v50 }
 0x110   :  { %v4385_v47 = vpop.eup %3370  ;;  %3386 = vtanh.f32 %v495_v44 }
 0x111   :  { %v3373_v54 = vpop.eup %3372  ;;  %3087 = vmatprep.subr.bf16.mxu1 %v3086_v36 }
 0x112   :  { %v3375_v57 = vpop.eup %3374  ;;  %v2819_v51 = vpop.f32.mrb[26].mxu0  ;;  %3089 = vmatpush3.bf16.msra.mxu1 %v5322_v35 }
 0x113   :  { %v4392_v22 = vpop.eup %3376  ;;  %3388 = vtanh.f32 %v2819_v51  ;;  %v505_v39 = vpop.f32.mrb[27].mxu0  ;;  %v3090_v34 = vpack.c.bf16 %v3373_v54, %v3375_v57  ;;  %v5324_v57 = vpack.c.bf16 %v4312_v17, %v4316_v46 }
 0x114   :  { %v4394_v26 = vpop.eup %3378  ;;  %3390 = vtanh.f32 %v505_v39 }
 0x115   :  { %v3381_v38 = vpop.eup %3380  ;;  %3091 = vmatprep.subr.bf16.mxu1 %v3090_v34 }
 0x116   :  { %v3383_v50 = vpop.eup %3382  ;;  %v2822_v44 = vpop.f32.mrb[28].mxu0  ;;  %3093 = vmatpush3.bf16.msra.mxu1 %v5323_v43  ;;  %v5325_v43 = vpack.c.bf16 %v4324_v9, %v4328_v3 }
 0x117   :  { %3392 = vtanh.f32 %v2822_v44  ;;  %v515_v21 = vpop.f32.mrb[29].mxu0  ;;  %v3094_v35 = vpack.c.bf16 %v3381_v38, %v3383_v50 }
 0x118   :  { %3394 = vtanh.f32 %v515_v21  ;;  %v5326_v21 = vpack.c.bf16 %v4336_v5, %v4340_v60 }
 0x119   :  { %v3385_v42 = vpop.eup %3384  ;;  %3095 = vmatprep.subr.bf16.mxu1 %v3094_v35 }
 0x11a   :  { %v3387_v51 = vpop.eup %3386  ;;  %v2825_v54 = vpop.f32.mrb[30].mxu0  ;;  %3097 = vmatpush3.bf16.msra.mxu1 %v5324_v57 }
 0x11b   :  { %3396 = vtanh.f32 %v2825_v54  ;;  %v525_v39 = vpop.f32.mrb[31].mxu0  ;;  %v3098_v34 = vpack.c.bf16 %v3385_v42, %v3387_v51 }
 0x11c   :  { %3398 = vtanh.f32 %v525_v39 }
 0x11d   :  { %v3389_v36 = vpop.eup %3388  ;;  %3099 = vmatprep.subr.bf16.mxu1 %v3098_v34  ;;  %v5328_v34 = vpack.c.bf16 %v4360_v58, %v4364_v52 }
 0x11e   :  { %v3391_v13 = vpop.eup %3390  ;;  %v2828_v45 = vpop.f32.mrb[32].mxu0  ;;  %3101 = vmatpush3.bf16.msra.mxu1 %v5325_v43  ;;  %v4427_v43 = vld [vmem:[%s5218_s2 + $0x28] sm:$0xff] }
 0x11f   :  { %3400 = vtanh.f32 %v2828_v45  ;;  %v535_v38 = vpop.f32.mrb[33].mxu0  ;;  %v3102_v50 = vpack.c.bf16 %v3389_v36, %v3391_v13  ;;  %v5327_v36 = vpack.c.bf16 %v4348_v62, %v4352_v56  ;;  %v4419_v13 = vld [vmem:[%s5218_s2] sm:$0xff]  ;;  %v5329_v62 = vpack.c.bf16 %v4318_v25, %v4322_v10 }
 0x120   :  { %3402 = vtanh.f32 %v535_v38  ;;  %v4434_v25 = vld [vmem:[%s5218_s2 + $0x20] sm:$0xff] }
 0x121   :  { %v3393_v44 = vpop.eup %3392  ;;  %3103 = vmatprep.subr.bf16.mxu1 %v3102_v50  ;;  %v5330_v50 = vpack.c.bf16 %v4330_v14, %v4334_v49 }
 0x122   :  { %v3395_v46 = vpop.eup %3394  ;;  %v2831_v17 = vpop.f32.mrb[34].mxu0  ;;  %3105 = vmatpush3.bf16.msra.mxu1 %v5326_v21 }
 0x123   :  { %3404 = vtanh.f32 %v2831_v17  ;;  %v545_v35 = vpop.f32.mrb[35].mxu0  ;;  %v3106_v42 = vpack.c.bf16 %v3393_v44, %v3395_v46  ;;  %v4442_v46 = vld [vmem:[%s5218_s2 + $0x18] sm:$0xff] }
 0x124   :  { %3406 = vtanh.f32 %v545_v35  ;;  %v5331_v35 = vpack.c.bf16 %v4342_v8, %v4346_v63  ;;  %v5334_v8 = vpack.c.bf16 %v4374_v53, %v4376_v40  ;;  %v5335_v63 = vpack.c.bf16 %v4282_v30, %v4286_v41  ;;  %v4476_v30 = vld [vmem:[%s5218_s2 + $0x10] sm:$0xff]  ;;  %v4481_v41 = vld [vmem:[%s5218_s2 + $0x38] sm:$0xff] }
 0x125   :  { %v3397_v51 = vpop.eup %3396  ;;  %3107 = vmatprep.subr.bf16.mxu1 %v3106_v42  ;;  %v5339_v40 = vpack.c.bf16 %v4306_v37, %v4310_v18 }
 0x126   :  { %v3399_v3 = vpop.eup %3398  ;;  %v2834_v9 = vpop.f32.mrb[36].mxu0  ;;  %3109 = vmatpush3.bf16.msra.mxu1 %v5327_v36 }
 0x127   :  { %3408 = vtanh.f32 %v2834_v9  ;;  %v555_v54 = vpop.f32.mrb[37].mxu0  ;;  %v3110_v57 = vpack.c.bf16 %v3397_v51, %v3399_v3  ;;  %v5332_v51 = vpack.c.bf16 %v4354_v4, %v4358_v59  ;;  %v5336_v4 = vpack.c.bf16 %v4383_v48, %v4385_v47  ;;  %v4493_v47 = vpop.permute.xlu0 %94 }
 0x128   :  { %3410 = vtanh.f32 %v555_v54  ;;  %v5333_v54 = vpack.c.bf16 %v4366_v61, %v4370_v55  ;;  %v5337_v59 = vpack.c.bf16 %v4294_v33, %v4298_v29  ;;  %v5338_v61 = vpack.c.bf16 %v4392_v22, %v4394_v26  ;;  %v4488_v33 = vld [vmem:[%s5218_s2 + $0x30] sm:$0xff] }
 0x129   :  { %v3401_v39 = vpop.eup %3400  ;;  %3111 = vmatprep.subr.bf16.mxu1 %v3110_v57 }
 0x12a   :  { %v3403_v60 = vpop.eup %3402  ;;  %v2837_v5 = vpop.f32.mrb[38].mxu0  ;;  %3113 = vmatpush3.bf16.msra.mxu1 %v5328_v34 }
 0x12b   :  { %3412 = vtanh.f32 %v2837_v5  ;;  %v565_v56 = vpop.f32.mrb[39].mxu0  ;;  %3115 = vmatprep.subr.bf16.mxu1 %v5329_v62  ;;  %v3116_v45 = vpack.c.bf16 %v3401_v39, %v3403_v60  ;;  %v4496_v5 = vpop.permute.xlu0 %99 }
 0x12c   :  { %3414 = vtanh.f32 %v565_v56 }
 0x12d   :  { %v3405_v52 = vpop.eup %3404  ;;  %823 = vmatmul.mubr.f32.vlgmr.msra.gmra.mrb[22].mxu1 %v4419_v13 }
 0x12e   :  { %v3407_v58 = vpop.eup %3406  ;;  %v2840_v38 = vpop.f32.mrb[40].mxu0  ;;  %3117 = vmatpush3.bf16.msra.mxu1 %v3116_v45  ;;  %827 = vmatprep.mubr.f32.mxu1 %v4427_v43 }
 0x12f   :  { %3416 = vtanh.f32 %v2840_v38  ;;  %v575_v10 = vpop.f32.mrb[41].mxu0  ;;  %3119 = vmatprep.subr.bf16.mxu1 %v5330_v50  ;;  %v3120_v44 = vpack.c.bf16 %v3405_v52, %v3407_v58 }
 0x130   :  { %3418 = vtanh.f32 %v575_v10 }
 0x131   :  { %v3409_v17 = vpop.eup %3408  ;;  %828 = vmatmul.mubr.f32.gmra.mrb[24].mxu1 %v4434_v25 }
 0x132   :  { %v3411_v21 = vpop.eup %3410  ;;  %3121 = vmatpush3.bf16.msra.mxu1 %v3120_v44  ;;  %897 = vmatprep.mubr.f32.mxu1 %v4442_v46 }
 0x133   :  { %3123 = vmatprep.subr.bf16.mxu1 %v5331_v35  ;;  %v3124_v14 = vpack.c.bf16 %v3409_v17, %v3411_v21  ;;  %v916_v17 = vld [vmem:[#allocation2 + $0x10] sm:$0x1]  ;;  %v5356_v21 = vld [vmem:[#allocation44_spill] sm:$0xff]  ;;  %v5357_v35 = vld [vmem:[#allocation45_spill] sm:$0xff] }
 0x135   :  { %v3413_v49 = vpop.eup %3412 }
 0x136   :  { %v3415_v42 = vpop.eup %3414  ;;  %3125 = vmatpush3.bf16.msra.mxu1 %v3124_v14  ;;  %v5358_v14 = vld [vmem:[#allocation46_spill] sm:$0xff] }
 0x137   :  { %3127 = vmatprep.subr.bf16.mxu1 %v5332_v51  ;;  %v3128_v3 = vpack.c.bf16 %v3413_v49, %v3415_v42  ;;  %v5359_v49 = vld [vmem:[#allocation47_spill] sm:$0xff]  ;;  %v5360_v42 = vld [vmem:[#allocation48_spill] sm:$0xff]  ;;  %v5361_v51 = vld [vmem:[#allocation49_spill] sm:$0xff] }
 0x139   :  { %v3417_v9 = vpop.eup %3416 }
 0x13a   :  { %v3419_v36 = vpop.eup %3418  ;;  %3129 = vmatpush3.bf16.msra.mxu1 %v3128_v3  ;;  %v5362_v3 = vld [vmem:[#allocation50_spill] sm:$0xff] }
 0x13b   :  { %3131 = vmatprep.subr.bf16.mxu1 %v5333_v54  ;;  %v3132_v57 = vpack.c.bf16 %v3417_v9, %v3419_v36  ;;  %v5363_v9 = vld [vmem:[#allocation51_spill] sm:$0xff]  ;;  %v5364_v36 = vld [vmem:[#allocation52_spill] sm:$0xff]  ;;  %v5365_v54 = vld [vmem:[#allocation53_spill] sm:$0xff] }
 0x13e   :  { %3133 = vmatpush3.bf16.msra.mxu1 %v3132_v57  ;;  %v5366_v57 = vld [vmem:[#allocation54_spill] sm:$0xff] }
 0x13f   :  { %3135 = vmatprep.subr.bf16.mxu1 %v5334_v8  ;;  %v5367_v8 = vld [vmem:[#allocation6_spill] sm:$0xff] }
 0x142   :  { %3137 = vmatpush3.bf16.msra.mxu1 %v5335_v63  ;;  %v5368_v63 = vld [vmem:[#allocation7_spill] sm:$0xff] }
 0x143   :  { %3139 = vmatprep.subr.bf16.mxu1 %v5336_v4  ;;  %v5369_v4 = vld [vmem:[#allocation8_spill] sm:$0xff] }
 0x146   :  { %3141 = vmatpush3.bf16.msra.mxu1 %v5337_v59  ;;  %v5370_v59 = vld [vmem:[#allocation9_spill] sm:$0xff] }
 0x147   :  { %3143 = vmatprep.subr.bf16.mxu1 %v5338_v61  ;;  %v5371_v61 = vld [vmem:[#allocation10_spill] sm:$0xff] }
 0x14a   :  { %3145 = vmatpush3.bf16.msra.mxu1 %v5339_v40  ;;  %v5372_v40 = vld [vmem:[#allocation11_spill] sm:$0xff] }
 0x14d   :  { %898 = vmatmul.mubr.f32.vlgmr.msra.gmra.mrb[26].mxu1 %v4476_v30 }
 0x14e   :  { %902 = vmatprep.mubr.f32.mxu1 %v4481_v41 }
 0x151   :  { %903 = vmatmul.mubr.f32.gmra.mrb[28].mxu1 %v4488_v33 }
 0x152   :  { %2880 = vmatprep.mubr.msk.f32.mxu1 %vm112_vm0, %v3814_v2 }
 0x200   :  { %v2442_v29 = vpop.f32.mrb[22].mxu1 }
 0x201   :  { %v2443_v37 = vpop.f32.mrb[23].mxu1 }
 0x202   :  { %v2444_v18 = vadd.f32 %v2443_v37, %v2442_v29  ;;  %v5373_v29 = vld [vmem:[#allocation12_spill] sm:$0xff]  ;;  %v5374_v37 = vld [vmem:[#allocation13_spill] sm:$0xff] }
 0x204   :  { %v2445_v55 = vpop.f32.mrb[24].mxu1  ;;  %v825_v39 = vadd.f32 %v2444_v18, %v4493_v47  ;;  %v5375_v18 = vld [vmem:[#allocation14_spill] sm:$0xff] }
 0x205   :  { %v2446_v53 = vpop.f32.mrb[25].mxu1 }
 0x206   :  { %v2447_v48 = vadd.f32 %v2446_v53, %v2445_v55  ;;  %v5376_v55 = vld [vmem:[#allocation15_spill] sm:$0xff]  ;;  %v5377_v53 = vld [vmem:[#allocation16_spill] sm:$0xff] }
 0x208   :  { %v830_v2 = vadd.f32 %v2447_v48, %v4496_v5  ;;  %v5378_v48 = vld [vmem:[#allocation17_spill] sm:$0xff] }
 0x220   :  { %v2480_v22 = vpop.f32.mrb[26].mxu1 }
 0x221   :  { %v2481_v26 = vpop.f32.mrb[27].mxu1 }
 0x222   :  { %v2482_v60 = vadd.f32 %v2481_v26, %v2480_v22  ;;  %v5379_v22 = vld [vmem:[#allocation18_spill] sm:$0xff]  ;;  %v5380_v26 = vld [vmem:[#allocation19_spill] sm:$0xff] }
 0x224   :  { %v900_v34 = vadd.f32 %v2482_v60, %v825_v39  ;;  %v2483_v56 = vpop.f32.mrb[28].mxu1  ;;  %v5381_v39 = vld [vmem:[#allocation20_spill] sm:$0xff]  ;;  %v5382_v60 = vld [vmem:[#allocation23_spill] sm:$0xff] }
 0x225   :  { %v2484_v62 = vpop.f32.mrb[29].mxu1 }
 0x226   :  { %v2485_v45 = vadd.f32 %v2484_v62, %v2483_v56  ;;  %v908_v52 = vadd.f32 %v900_v34, %v3804_v0  ;;  %v5340_v0 = vld [vmem:[#allocation21_spill] sm:$0xff]  ;;  %v5383_v34 = vld [vmem:[#allocation24_spill] sm:$0xff]  ;;  %v5384_v56 = vld [vmem:[#allocation27_spill] sm:$0xff] }
 0x227   :  { %v5385_v62 = vld [vmem:[#allocation28_spill] sm:$0xff] }
 0x228   :  { %v905_v58 = vadd.f32 %v2485_v45, %v830_v2  ;;  %v4501_v10 = vmul.f32 0.5, %v908_v52  ;;  %v5386_v2 = vld [vmem:[#allocation31_spill] sm:$0xff]  ;;  %v5387_v45 = vld [vmem:[#allocation32_spill] sm:$0xff] }
 0x229   :  { %v5388_v52 = vld [vmem:[#allocation35_spill] sm:$0xff] }
 0x22a   :  { %v909_v38 = vadd.f32 %v905_v58, %v3809_v1  ;;  %v5341_v1 = vld [vmem:[#allocation22_spill] sm:$0xff]  ;;  %v5389_v58 = vld [vmem:[#allocation55_spill] sm:$0xff] }
 0x22c   :  { %v4503_v50 = vmul.f32 0.5, %v909_v38 }
 0x22e   :  { %v3146_v44 = vpack.c.bf16 %v4503_v50, %v4501_v10 }
 0x230   :  { %3147 = vmatprep.subr.bf16.mxu1 %v3146_v44 }
 0x231   :  { %3149 = vmatpush3.bf16.msra.mxu1 %v3146_v44 }
 0x232   :  { %2878 = vmatprep.subr.msk.mxu1 %vm305_vm1, %v916_v17 }
 0x235   :  { %2879 = vmatpush3.msk.msra.mxu1 %vm305_vm1, %v916_v17 }
 0x236   :  { %2881 = vmatmul.mubr.msk.f32.vlgmr.msra.gmra.mrb[30].mxu1 %vm112_vm0, %v3823_v6  ;;  %v5342_v6 = vld [vmem:[#allocation25_spill] sm:$0xff] }
 0x237   :  { %2883 = vmatprep.mubr.msk.f32.mxu1 %vm112_vm0, %v3829_v7  ;;  %v5343_v7 = vld [vmem:[#allocation26_spill] sm:$0xff] }
 0x23a   :  { %2884 = vmatmul.mubr.msk.f32.gmra.mrb[32].mxu1 %vm112_vm0, %v3858_v11  ;;  %v5344_v11 = vld [vmem:[#allocation29_spill] sm:$0xff] }
 0x23b   :  { %2886 = vmatprep.mubr.msk.f32.mxu1 %vm112_vm0, %v3865_v12  ;;  %v5345_v12 = vld [vmem:[#allocation30_spill] sm:$0xff] }
 0x23e   :  { %2887 = vmatmul.mubr.msk.f32.gmra.mrb[34].mxu1 %vm112_vm0, %v3886_v15  ;;  %v5346_v15 = vld [vmem:[#allocation33_spill] sm:$0xff] }
 0x23f   :  { %2889 = vmatprep.mubr.msk.f32.mxu1 %vm112_vm0, %v3893_v16  ;;  %v5347_v16 = vld [vmem:[#allocation34_spill] sm:$0xff] }
 0x242   :  { %2890 = vmatmul.mubr.msk.f32.gmra.mrb[36].mxu1 %vm112_vm0, %v3914_v19  ;;  %v5348_v19 = vld [vmem:[#allocation36_spill] sm:$0xff] }
 0x243   :  { %2892 = vmatprep.mubr.msk.f32.mxu1 %vm112_vm0, %v3921_v20  ;;  %v5349_v20 = vld [vmem:[#allocation37_spill] sm:$0xff] }
 0x246   :  { %2893 = vmatmul.mubr.msk.f32.gmra.mrb[38].mxu1 %vm112_vm0, %v3942_v23  ;;  %v5350_v23 = vld [vmem:[#allocation38_spill] sm:$0xff] }
 0x247   :  { %2895 = vmatprep.mubr.msk.f32.mxu1 %vm112_vm0, %v3949_v24  ;;  %v5351_v24 = vld [vmem:[#allocation39_spill] sm:$0xff] }
 0x24a   :  { %2896 = vmatmul.mubr.msk.f32.gmra.mrb[40].mxu1 %vm112_vm0, %v3970_v27  ;;  %v5352_v27 = vld [vmem:[#allocation40_spill] sm:$0xff] }
 0x24b   :  { %2898 = vmatprep.mubr.msk.f32.mxu1 %vm112_vm0, %v3977_v28  ;;  %v5353_v28 = vld [vmem:[#allocation41_spill] sm:$0xff] }
 0x24e   :  { %2899 = vmatmul.mubr.msk.f32.gmra.mrb[42].mxu1 %vm112_vm0, %v3998_v31  ;;  %v5354_v31 = vld [vmem:[#allocation42_spill] sm:$0xff] }
 0x24f   :  { %2901 = vmatprep.mubr.msk.f32.mxu1 %vm112_vm0, %v4005_v32  ;;  %v5355_v32 = vld [vmem:[#allocation43_spill] sm:$0xff] }
 0x252   :  { %2902 = vmatmul.mubr.msk.f32.gmra.mrb[44].mxu1 %vm112_vm0, %v5340_v0 }
 0x253   :  { %2904 = vmatprep.mubr.msk.f32.mxu1 %vm112_vm0, %v5341_v1 }
 0x256   :  { %2905 = vmatmul.mubr.msk.f32.gmra.mrb[46].mxu1 %vm112_vm0, %v5342_v6 }
 0x257   :  { %2907 = vmatprep.mubr.msk.f32.mxu1 %vm112_vm0, %v5343_v7 }
 0x25a   :  { %2908 = vmatmul.mubr.msk.f32.gmra.mrb[48].mxu1 %vm112_vm0, %v5344_v11 }
 0x25b   :  { %2910 = vmatprep.mubr.msk.f32.mxu1 %vm112_vm0, %v5345_v12 }
 0x25e   :  { %2911 = vmatmul.mubr.msk.f32.gmra.mrb[50].mxu1 %vm112_vm0, %v5346_v15 }
 0x25f   :  { %2913 = vmatprep.mubr.msk.f32.mxu1 %vm112_vm0, %v5347_v16 }
 0x262   :  { %2914 = vmatmul.mubr.msk.f32.gmra.mrb[52].mxu1 %vm112_vm0, %v5348_v19 }
 0x263   :  { %2916 = vmatprep.mubr.msk.f32.mxu1 %vm112_vm0, %v5349_v20 }
 0x266   :  { %2917 = vmatmul.mubr.msk.f32.gmra.mrb[54].mxu1 %vm112_vm0, %v5350_v23 }
 0x267   :  { %2919 = vmatprep.mubr.msk.f32.mxu1 %vm112_vm0, %v5351_v24 }
 0x26a   :  { %2920 = vmatmul.mubr.msk.f32.gmra.mrb[56].mxu1 %vm112_vm0, %v5352_v27 }
 0x26b   :  { %2922 = vmatprep.mubr.msk.f32.mxu1 %vm112_vm0, %v5353_v28 }
 0x26e   :  { %2923 = vmatmul.mubr.msk.f32.gmra.mrb[58].mxu1 %vm112_vm0, %v5354_v31 }
 0x26f   :  { %2925 = vmatprep.mubr.msk.f32.mxu1 %vm112_vm0, %v5355_v32 }
 0x272   :  { %2926 = vmatmul.mubr.msk.f32.gmra.mrb[60].mxu1 %vm112_vm0, %v5356_v21 }
 0x273   :  { %2928 = vmatprep.mubr.msk.f32.mxu1 %vm112_vm0, %v5357_v35 }
 0x276   :  { %2929 = vmatmul.mubr.msk.f32.gmra.mrb[62].mxu1 %vm112_vm0, %v5358_v14 }
 0x277   :  { %2931 = vmatprep.mubr.msk.f32.mxu1 %vm112_vm0, %v5359_v49 }
 0x27a   :  { %2932 = vmatmul.mubr.msk.f32.gmra.mrb[64].mxu1 %vm112_vm0, %v5360_v42 }
 0x27b   :  { %2934 = vmatprep.mubr.msk.f32.mxu1 %vm112_vm0, %v5361_v51 }
 0x27e   :  { %2935 = vmatmul.mubr.msk.f32.gmra.mrb[66].mxu1 %vm112_vm0, %v5362_v3 }
 0x27f   :  { %2937 = vmatprep.mubr.msk.f32.mxu1 %vm112_vm0, %v5363_v9 }
 0x282   :  { %2938 = vmatmul.mubr.msk.f32.gmra.mrb[68].mxu1 %vm112_vm0, %v5364_v36 }
 0x283   :  { %2940 = vmatprep.mubr.msk.f32.mxu1 %vm112_vm0, %v5365_v54 }
 0x286   :  { %2941 = vmatmul.mubr.msk.f32.gmra.mrb[70].mxu1 %vm112_vm0, %v5366_v57 }
 0x287   :  { %2943 = vmatprep.mubr.msk.f32.mxu1 %vm112_vm0, %v5367_v8 }
 0x28a   :  { %2944 = vmatmul.mubr.msk.f32.gmra.mrb[72].mxu1 %vm112_vm0, %v5368_v63 }
 0x28b   :  { %2946 = vmatprep.mubr.msk.f32.mxu1 %vm112_vm0, %v5369_v4 }
 0x28e   :  { %2947 = vmatmul.mubr.msk.f32.gmra.mrb[74].mxu1 %vm112_vm0, %v5370_v59 }
 0x28f   :  { %2949 = vmatprep.mubr.msk.f32.mxu1 %vm112_vm0, %v5371_v61 }
 0x292   :  { %2950 = vmatmul.mubr.msk.f32.gmra.mrb[76].mxu1 %vm112_vm0, %v5372_v40 }
 0x293   :  { %2952 = vmatprep.mubr.msk.f32.mxu1 %vm112_vm0, %v5373_v29 }
 0x296   :  { %2953 = vmatmul.mubr.msk.f32.gmra.mrb[78].mxu1 %vm112_vm0, %v5374_v37 }
 0x297   :  { %2955 = vmatprep.mubr.msk.f32.mxu1 %vm112_vm0, %v5375_v18 }
 0x29a   :  { %2956 = vmatmul.mubr.msk.f32.gmra.mrb[80].mxu1 %vm112_vm0, %v5376_v55 }
 0x29b   :  { %2958 = vmatprep.mubr.msk.f32.mxu1 %vm112_vm0, %v5377_v53 }
 0x29e   :  { %2959 = vmatmul.mubr.msk.f32.gmra.mrb[82].mxu1 %vm112_vm0, %v5378_v48 }
 0x29f   :  { %2961 = vmatprep.mubr.msk.f32.mxu1 %vm112_vm0, %v5379_v22 }
 0x2a2   :  { %2962 = vmatmul.mubr.msk.f32.gmra.mrb[84].mxu1 %vm112_vm0, %v5380_v26 }
 0x2a3   :  { %2964 = vmatprep.mubr.msk.f32.mxu1 %vm112_vm0, %v5381_v39 }
 0x2a6   :  { %2965 = vmatmul.mubr.msk.f32.gmra.mrb[86].mxu1 %vm112_vm0, %v5382_v60 }
 0x2a7   :  { %2967 = vmatprep.mubr.msk.f32.mxu1 %vm112_vm0, %v5383_v34 }
 0x2aa   :  { %2968 = vmatmul.mubr.msk.f32.gmra.mrb[88].mxu1 %vm112_vm0, %v5384_v56 }
 0x2ab   :  { %2970 = vmatprep.mubr.msk.f32.mxu1 %vm112_vm0, %v5385_v62 }
 0x2ae   :  { %2971 = vmatmul.mubr.msk.f32.gmra.mrb[90].mxu1 %vm112_vm0, %v5386_v2 }
 0x2af   :  { %2973 = vmatprep.mubr.msk.f32.mxu1 %vm112_vm0, %v5387_v45 }
 0x2b2   :  { %2974 = vmatmul.mubr.msk.f32.gmra.mrb[92].mxu1 %vm112_vm0, %v5388_v52 }
 0x2b3   :  { %2044 = vmatprep.mubr.f32.mxu1 %v5389_v58 }
 0x309   :  { %v2882_v38 = vpop.f32.mrb[30].mxu1 }
 0x30a   :  { %3420 = vtanh.f32 %v2882_v38  ;;  %v986_v44 = vpop.f32.mrb[31].mxu1 }
 0x30b   :  { %3422 = vtanh.f32 %v986_v44 }
 0x30d   :  { %v2885_v17 = vpop.f32.mrb[32].mxu1 }
 0x30e   :  { %3424 = vtanh.f32 %v2885_v17  ;;  %v996_v0 = vpop.f32.mrb[33].mxu1 }
 0x30f   :  { %3426 = vtanh.f32 %v996_v0 }
 0x311   :  { %v2888_v1 = vpop.f32.mrb[34].mxu1 }
 0x312   :  { %3428 = vtanh.f32 %v2888_v1  ;;  %v1006_v6 = vpop.f32.mrb[35].mxu1 }
 0x313   :  { %3430 = vtanh.f32 %v1006_v6 }
 0x314   :  { %v4636_v7 = vpop.eup %3420 }
 0x315   :  { %v4638_v11 = vpop.eup %3422  ;;  %v2891_v12 = vpop.f32.mrb[36].mxu1 }
 0x316   :  { %3432 = vtanh.f32 %v2891_v12  ;;  %v1016_v15 = vpop.f32.mrb[37].mxu1  ;;  %v3152_v16 = vpack.c.bf16 %v4636_v7, %v4638_v11 }
 0x317   :  { %3434 = vtanh.f32 %v1016_v15 }
 0x318   :  { %v4642_v19 = vpop.eup %3424 }
 0x319   :  { %v4644_v20 = vpop.eup %3426  ;;  %v2894_v23 = vpop.f32.mrb[38].mxu1 }
 0x31a   :  { %3436 = vtanh.f32 %v2894_v23  ;;  %v1026_v24 = vpop.f32.mrb[39].mxu1  ;;  %v3156_v27 = vpack.c.bf16 %v4642_v19, %v4644_v20 }
 0x31b   :  { %3438 = vtanh.f32 %v1026_v24 }
 0x31c   :  { %v4648_v28 = vpop.eup %3428 }
 0x31d   :  { %v4650_v31 = vpop.eup %3430  ;;  %v2897_v32 = vpop.f32.mrb[40].mxu1 }
 0x31e   :  { %3440 = vtanh.f32 %v2897_v32  ;;  %v1036_v21 = vpop.f32.mrb[41].mxu1  ;;  %v3160_v35 = vpack.c.bf16 %v4648_v28, %v4650_v31 }
 0x31f   :  { %3442 = vtanh.f32 %v1036_v21 }
 0x320   :  { %v4654_v14 = vpop.eup %3432 }
 0x321   :  { %v4656_v49 = vpop.eup %3434  ;;  %v2900_v42 = vpop.f32.mrb[42].mxu1 }
 0x322   :  { %3444 = vtanh.f32 %v2900_v42  ;;  %v1046_v51 = vpop.f32.mrb[43].mxu1  ;;  %v3164_v3 = vpack.c.bf16 %v4654_v14, %v4656_v49 }
 0x323   :  { %3446 = vtanh.f32 %v1046_v51 }
 0x324   :  { %v4660_v9 = vpop.eup %3436 }
 0x325   :  { %v4662_v36 = vpop.eup %3438  ;;  %v2903_v54 = vpop.f32.mrb[44].mxu1 }
 0x326   :  { %3448 = vtanh.f32 %v2903_v54  ;;  %v1056_v57 = vpop.f32.mrb[45].mxu1  ;;  %v3168_v8 = vpack.c.bf16 %v4660_v9, %v4662_v36 }
 0x327   :  { %3450 = vtanh.f32 %v1056_v57 }
 0x328   :  { %v4666_v63 = vpop.eup %3440 }
 0x329   :  { %v4668_v4 = vpop.eup %3442  ;;  %v2906_v59 = vpop.f32.mrb[46].mxu1 }
 0x32a   :  { %3452 = vtanh.f32 %v2906_v59  ;;  %v1066_v61 = vpop.f32.mrb[47].mxu1  ;;  %v3172_v40 = vpack.c.bf16 %v4666_v63, %v4668_v4 }
 0x32b   :  { %3454 = vtanh.f32 %v1066_v61 }
 0x32c   :  { %v4672_v29 = vpop.eup %3444 }
 0x32d   :  { %v4674_v37 = vpop.eup %3446  ;;  %v2909_v18 = vpop.f32.mrb[48].mxu1 }
 0x32e   :  { %3456 = vtanh.f32 %v2909_v18  ;;  %v1076_v55 = vpop.f32.mrb[49].mxu1  ;;  %v3176_v53 = vpack.c.bf16 %v4672_v29, %v4674_v37 }
 0x32f   :  { %3458 = vtanh.f32 %v1076_v55 }
 0x330   :  { %v4678_v48 = vpop.eup %3448 }
 0x331   :  { %v4680_v22 = vpop.eup %3450  ;;  %v2912_v26 = vpop.f32.mrb[50].mxu1 }
 0x332   :  { %3460 = vtanh.f32 %v2912_v26  ;;  %v1086_v39 = vpop.f32.mrb[51].mxu1  ;;  %v3180_v60 = vpack.c.bf16 %v4678_v48, %v4680_v22 }
 0x333   :  { %3462 = vtanh.f32 %v1086_v39 }
 0x334   :  { %v3453_v34 = vpop.eup %3452 }
 0x335   :  { %v3455_v56 = vpop.eup %3454  ;;  %v2915_v62 = vpop.f32.mrb[52].mxu1 }
 0x336   :  { %3464 = vtanh.f32 %v2915_v62  ;;  %v1096_v2 = vpop.f32.mrb[53].mxu1  ;;  %v3150_v45 = vpack.c.bf16 %v3453_v34, %v3455_v56 }
 0x337   :  { %3466 = vtanh.f32 %v1096_v2 }
 0x338   :  { %v3457_v52 = vpop.eup %3456  ;;  %3151 = vmatprep.subr.bf16.mxu0 %v3150_v45 }
 0x339   :  { %v3459_v58 = vpop.eup %3458  ;;  %v2918_v38 = vpop.f32.mrb[54].mxu1  ;;  %3153 = vmatpush3.bf16.msra.mxu0 %v3152_v16 }
 0x33a   :  { %3468 = vtanh.f32 %v2918_v38  ;;  %v1106_v44 = vpop.f32.mrb[55].mxu1  ;;  %v3154_v17 = vpack.c.bf16 %v3457_v52, %v3459_v58 }
 0x33b   :  { %3470 = vtanh.f32 %v1106_v44 }
 0x33c   :  { %v3461_v0 = vpop.eup %3460  ;;  %3155 = vmatprep.subr.bf16.mxu0 %v3154_v17 }
 0x33d   :  { %v3463_v1 = vpop.eup %3462  ;;  %v2921_v6 = vpop.f32.mrb[56].mxu1  ;;  %3157 = vmatpush3.bf16.msra.mxu0 %v3156_v27 }
 0x33e   :  { %3472 = vtanh.f32 %v2921_v6  ;;  %v1116_v7 = vpop.f32.mrb[57].mxu1  ;;  %v3158_v11 = vpack.c.bf16 %v3461_v0, %v3463_v1 }
 0x33f   :  { %3474 = vtanh.f32 %v1116_v7 }
 0x340   :  { %v3465_v12 = vpop.eup %3464  ;;  %3159 = vmatprep.subr.bf16.mxu0 %v3158_v11 }
 0x341   :  { %v3467_v15 = vpop.eup %3466  ;;  %v2924_v16 = vpop.f32.mrb[58].mxu1  ;;  %3161 = vmatpush3.bf16.msra.mxu0 %v3160_v35 }
 0x342   :  { %3476 = vtanh.f32 %v2924_v16  ;;  %v1126_v23 = vpop.f32.mrb[59].mxu1  ;;  %v3162_v24 = vpack.c.bf16 %v3465_v12, %v3467_v15 }
 0x343   :  { %3478 = vtanh.f32 %v1126_v23 }
 0x344   :  { %v3469_v32 = vpop.eup %3468  ;;  %3163 = vmatprep.subr.bf16.mxu0 %v3162_v24 }
 0x345   :  { %v3471_v19 = vpop.eup %3470  ;;  %v2927_v20 = vpop.f32.mrb[60].mxu1  ;;  %3165 = vmatpush3.bf16.msra.mxu0 %v3164_v3 }
 0x346   :  { %3480 = vtanh.f32 %v2927_v20  ;;  %v1136_v27 = vpop.f32.mrb[61].mxu1  ;;  %v3166_v21 = vpack.c.bf16 %v3469_v32, %v3471_v19 }
 0x347   :  { %3482 = vtanh.f32 %v1136_v27 }
 0x348   :  { %v3473_v42 = vpop.eup %3472  ;;  %3167 = vmatprep.subr.bf16.mxu0 %v3166_v21 }
 0x349   :  { %v3475_v28 = vpop.eup %3474  ;;  %v2930_v31 = vpop.f32.mrb[62].mxu1  ;;  %3169 = vmatpush3.bf16.msra.mxu0 %v3168_v8 }
 0x34a   :  { %3484 = vtanh.f32 %v2930_v31  ;;  %v1146_v35 = vpop.f32.mrb[63].mxu1  ;;  %v3170_v51 = vpack.c.bf16 %v3473_v42, %v3475_v28 }
 0x34b   :  { %3486 = vtanh.f32 %v1146_v35 }
 0x34c   :  { %v3477_v54 = vpop.eup %3476  ;;  %3171 = vmatprep.subr.bf16.mxu0 %v3170_v51 }
 0x34d   :  { %v3479_v14 = vpop.eup %3478  ;;  %v2933_v49 = vpop.f32.mrb[64].mxu1  ;;  %3173 = vmatpush3.bf16.msra.mxu0 %v3172_v40 }
 0x34e   :  { %3488 = vtanh.f32 %v2933_v49  ;;  %v1156_v3 = vpop.f32.mrb[65].mxu1  ;;  %v3174_v57 = vpack.c.bf16 %v3477_v54, %v3479_v14 }
 0x34f   :  { %3490 = vtanh.f32 %v1156_v3 }
 0x350   :  { %v3481_v59 = vpop.eup %3480  ;;  %3175 = vmatprep.subr.bf16.mxu0 %v3174_v57 }
 0x351   :  { %v3483_v9 = vpop.eup %3482  ;;  %v2936_v36 = vpop.f32.mrb[66].mxu1  ;;  %3177 = vmatpush3.bf16.msra.mxu0 %v3176_v53 }
 0x352   :  { %3492 = vtanh.f32 %v2936_v36  ;;  %v1166_v8 = vpop.f32.mrb[67].mxu1  ;;  %v3178_v61 = vpack.c.bf16 %v3481_v59, %v3483_v9 }
 0x353   :  { %3494 = vtanh.f32 %v1166_v8 }
 0x354   :  { %v4702_v18 = vpop.eup %3484  ;;  %3179 = vmatprep.subr.bf16.mxu0 %v3178_v61 }
 0x355   :  { %v4704_v63 = vpop.eup %3486  ;;  %v2939_v4 = vpop.f32.mrb[68].mxu1  ;;  %3181 = vmatpush3.bf16.msra.mxu0 %v3180_v60 }
 0x356   :  { %3496 = vtanh.f32 %v2939_v4  ;;  %v1176_v40 = vpop.f32.mrb[69].mxu1  ;;  %v3184_v29 = vpack.c.bf16 %v4702_v18, %v4704_v63 }
 0x357   :  { %3498 = vtanh.f32 %v1176_v40 }
 0x358   :  { %v4711_v37 = vpop.eup %3488  ;;  %1434 = vmatmul.mubr.f32.vlgmr.msra.gmra.mrb[42].mxu0 %v4419_v13 }
 0x359   :  { %v4714_v55 = vpop.eup %3490  ;;  %v2942_v53 = vpop.f32.mrb[70].mxu1  ;;  %1438 = vmatprep.mubr.f32.mxu0 %v4427_v43 }
 0x35a   :  { %3500 = vtanh.f32 %v2942_v53  ;;  %v1186_v26 = vpop.f32.mrb[71].mxu1  ;;  %v3188_v48 = vpack.c.bf16 %v4711_v37, %v4714_v55 }
 0x35b   :  { %3502 = vtanh.f32 %v1186_v26 }
 0x35c   :  { %v4719_v22 = vpop.eup %3492  ;;  %1439 = vmatmul.mubr.f32.gmra.mrb[44].mxu0 %v4434_v25 }
 0x35d   :  { %v4722_v39 = vpop.eup %3494  ;;  %v2945_v60 = vpop.f32.mrb[72].mxu1  ;;  %1508 = vmatprep.mubr.f32.mxu0 %v4442_v46 }
 0x35e   :  { %3504 = vtanh.f32 %v2945_v60  ;;  %v1196_v13 = vpop.f32.mrb[73].mxu1  ;;  %v3192_v43 = vpack.c.bf16 %v4719_v22, %v4722_v39 }
 0x35f   :  { %3506 = vtanh.f32 %v1196_v13 }
 0x360   :  { %v4727_v34 = vpop.eup %3496 }
 0x361   :  { %v4729_v56 = vpop.eup %3498  ;;  %v2948_v62 = vpop.f32.mrb[74].mxu1 }
 0x362   :  { %3508 = vtanh.f32 %v2948_v62  ;;  %v1206_v2 = vpop.f32.mrb[75].mxu1  ;;  %v3196_v25 = vpack.c.bf16 %v4727_v34, %v4729_v56  ;;  %v3676_v62 = vld [vmem:[%s5217_s1] sm:$0xff] }
 0x363   :  { %3510 = vtanh.f32 %v1206_v2 }
 0x364   :  { %v4733_v45 = vpop.eup %3500 }
 0x365   :  { %v4735_v46 = vpop.eup %3502  ;;  %v2951_v52 = vpop.f32.mrb[76].mxu1 }
 0x366   :  { %3512 = vtanh.f32 %v2951_v52  ;;  %v1216_v58 = vpop.f32.mrb[77].mxu1  ;;  %v3200_v38 = vpack.c.bf16 %v4733_v45, %v4735_v46 }
 0x367   :  { %3514 = vtanh.f32 %v1216_v58 }
 0x368   :  { %v4739_v44 = vpop.eup %3504 }
 0x369   :  { %v4741_v17 = vpop.eup %3506  ;;  %v2954_v0 = vpop.f32.mrb[78].mxu1 }
 0x36a   :  { %3516 = vtanh.f32 %v2954_v0  ;;  %v1226_v1 = vpop.f32.mrb[79].mxu1  ;;  %v3204_v6 = vpack.c.bf16 %v4739_v44, %v4741_v17 }
 0x36b   :  { %3518 = vtanh.f32 %v1226_v1 }
 0x36c   :  { %v4745_v7 = vpop.eup %3508 }
 0x36d   :  { %v4747_v11 = vpop.eup %3510  ;;  %v2957_v12 = vpop.f32.mrb[80].mxu1 }
 0x36e   :  { %3520 = vtanh.f32 %v2957_v12  ;;  %v1236_v15 = vpop.f32.mrb[81].mxu1  ;;  %v3208_v16 = vpack.c.bf16 %v4745_v7, %v4747_v11 }
 0x36f   :  { %3522 = vtanh.f32 %v1236_v15 }
 0x370   :  { %v4751_v23 = vpop.eup %3512 }
 0x371   :  { %v4753_v24 = vpop.eup %3514  ;;  %v2960_v32 = vpop.f32.mrb[82].mxu1 }
 0x372   :  { %3524 = vtanh.f32 %v2960_v32  ;;  %v1246_v19 = vpop.f32.mrb[83].mxu1  ;;  %v3212_v20 = vpack.c.bf16 %v4751_v23, %v4753_v24  ;;  %v1527_v24 = vld [vmem:[#allocation2 + $0x10] sm:$0x1]  ;;  %v3677_v32 = vld [vmem:[%s5217_s1 + $0x8] sm:$0xff] }
 0x373   :  { %3526 = vtanh.f32 %v1246_v19  ;;  %v3680_v19 = vld [vmem:[%s5217_s1 + $0x20] sm:$0xff] }
 0x374   :  { %v3517_v27 = vpop.eup %3516 }
 0x375   :  { %v3519_v21 = vpop.eup %3518  ;;  %v2963_v42 = vpop.f32.mrb[84].mxu1 }
 0x376   :  { %3528 = vtanh.f32 %v2963_v42  ;;  %v1256_v28 = vpop.f32.mrb[85].mxu1  ;;  %v3182_v31 = vpack.c.bf16 %v3517_v27, %v3519_v21  ;;  %v3682_v27 = vld [vmem:[%s5217_s1 + $0x30] sm:$0xff]  ;;  %v3683_v21 = vld [vmem:[%s5217_s1 + $0x38] sm:$0xff]  ;;  %v3684_v42 = vld [vmem:[%s5217_s1 + $0x40] sm:$0xff] }
 0x377   :  { %3530 = vtanh.f32 %v1256_v28  ;;  %v3685_v28 = vld [vmem:[%s5217_s1 + $0x48] sm:$0xff] }
 0x378   :  { %v3521_v35 = vpop.eup %3520  ;;  %3183 = vmatprep.subr.bf16.mxu0 %v3182_v31  ;;  %v3686_v31 = vld [vmem:[%s5217_s1 + $0x50] sm:$0xff] }
 0x379   :  { %v3523_v51 = vpop.eup %3522  ;;  %v2966_v54 = vpop.f32.mrb[86].mxu1  ;;  %3185 = vmatpush3.bf16.msra.mxu0 %v3184_v29 }
 0x37a   :  { %3532 = vtanh.f32 %v2966_v54  ;;  %v1266_v14 = vpop.f32.mrb[87].mxu1  ;;  %v3186_v49 = vpack.c.bf16 %v3521_v35, %v3523_v51  ;;  %v3687_v35 = vld [vmem:[%s5217_s1 + $0x58] sm:$0xff]  ;;  %v3688_v51 = vld [vmem:[%s5217_s1 + $0x60] sm:$0xff]  ;;  %v3689_v54 = vld [vmem:[%s5217_s1 + $0x68] sm:$0xff] }
 0x37b   :  { %3534 = vtanh.f32 %v1266_v14  ;;  %v3690_v14 = vld [vmem:[%s5217_s1 + $0x70] sm:$0xff] }
 0x37c   :  { %v3525_v3 = vpop.eup %3524  ;;  %3187 = vmatprep.subr.bf16.mxu0 %v3186_v49  ;;  %v3691_v49 = vld [vmem:[%s5217_s1 + $0x78] sm:$0xff] }
 0x37d   :  { %v3527_v57 = vpop.eup %3526  ;;  %v2969_v59 = vpop.f32.mrb[88].mxu1  ;;  %3189 = vmatpush3.bf16.msra.mxu0 %v3188_v48 }
 0x37e   :  { %3536 = vtanh.f32 %v2969_v59  ;;  %v1276_v9 = vpop.f32.mrb[89].mxu1  ;;  %v3190_v36 = vpack.c.bf16 %v3525_v3, %v3527_v57  ;;  %v3692_v3 = vld [vmem:[%s5217_s1 + $0x80] sm:$0xff]  ;;  %v3693_v57 = vld [vmem:[%s5217_s1 + $0x88] sm:$0xff]  ;;  %v3694_v59 = vld [vmem:[%s5217_s1 + $0x90] sm:$0xff] }
 0x37f   :  { %3538 = vtanh.f32 %v1276_v9  ;;  %v3695_v9 = vld [vmem:[%s5217_s1 + $0x98] sm:$0xff] }
 0x380   :  { %v3529_v8 = vpop.eup %3528  ;;  %3191 = vmatprep.subr.bf16.mxu0 %v3190_v36  ;;  %v3696_v36 = vld [vmem:[%s5217_s1 + $0xa0] sm:$0xff] }
 0x381   :  { %v3531_v61 = vpop.eup %3530  ;;  %v2972_v18 = vpop.f32.mrb[90].mxu1  ;;  %3193 = vmatpush3.bf16.msra.mxu0 %v3192_v43 }
 0x382   :  { %3540 = vtanh.f32 %v2972_v18  ;;  %v1286_v63 = vpop.f32.mrb[91].mxu1  ;;  %v3194_v4 = vpack.c.bf16 %v3529_v8, %v3531_v61  ;;  %v3697_v8 = vld [vmem:[%s5217_s1 + $0xa8] sm:$0xff]  ;;  %v3698_v61 = vld [vmem:[%s5217_s1 + $0xb0] sm:$0xff]  ;;  %v3699_v18 = vld [vmem:[%s5217_s1 + $0xb8] sm:$0xff] }
 0x383   :  { %3542 = vtanh.f32 %v1286_v63  ;;  %v3700_v63 = vld [vmem:[%s5217_s1 + $0xc0] sm:$0xff] }
 0x384   :  { %v3533_v40 = vpop.eup %3532  ;;  %3195 = vmatprep.subr.bf16.mxu0 %v3194_v4  ;;  %v3701_v4 = vld [vmem:[%s5217_s1 + $0xc8] sm:$0xff] }
 0x385   :  { %v3535_v29 = vpop.eup %3534  ;;  %v2975_v37 = vpop.f32.mrb[92].mxu1  ;;  %3197 = vmatpush3.bf16.msra.mxu0 %v3196_v25 }
 0x386   :  { %3544 = vtanh.f32 %v2975_v37  ;;  %v1296_v55 = vpop.f32.mrb[93].mxu1  ;;  %v3198_v53 = vpack.c.bf16 %v3533_v40, %v3535_v29  ;;  %v3702_v40 = vld [vmem:[%s5217_s1 + $0xd0] sm:$0xff]  ;;  %v3703_v29 = vld [vmem:[%s5217_s1 + $0xd8] sm:$0xff]  ;;  %v3704_v37 = vld [vmem:[%s5217_s1 + $0xe0] sm:$0xff] }
 0x387   :  { %3546 = vtanh.f32 %v1296_v55  ;;  %v3705_v55 = vld [vmem:[%s5217_s1 + $0xe8] sm:$0xff] }
 0x388   :  { %v3537_v26 = vpop.eup %3536  ;;  %3199 = vmatprep.subr.bf16.mxu0 %v3198_v53  ;;  %v3706_v53 = vld [vmem:[%s5217_s1 + $0xf0] sm:$0xff] }
 0x389   :  { %v3539_v48 = vpop.eup %3538  ;;  %3201 = vmatpush3.bf16.msra.mxu0 %v3200_v38 }
 0x38a   :  { %v3202_v22 = vpack.c.bf16 %v3537_v26, %v3539_v48  ;;  %v3707_v26 = vld [vmem:[%s5217_s1 + $0xf8] sm:$0xff]  ;;  %v3708_v48 = vld [vmem:[%s5217_s1 + $0x100] sm:$0xff] }
 0x38c   :  { %v3541_v39 = vpop.eup %3540  ;;  %3203 = vmatprep.subr.bf16.mxu0 %v3202_v22  ;;  %v3709_v22 = vld [vmem:[%s5217_s1 + $0x108] sm:$0xff] }
 0x38d   :  { %v3543_v60 = vpop.eup %3542  ;;  %3205 = vmatpush3.bf16.msra.mxu0 %v3204_v6 }
 0x38e   :  { %v3206_v13 = vpack.c.bf16 %v3541_v39, %v3543_v60  ;;  %v3710_v39 = vld [vmem:[%s5217_s1 + $0x110] sm:$0xff]  ;;  %v3711_v60 = vld [vmem:[%s5217_s1 + $0x118] sm:$0xff] }
 0x390   :  { %v3545_v43 = vpop.eup %3544  ;;  %3207 = vmatprep.subr.bf16.mxu0 %v3206_v13  ;;  %v3712_v13 = vld [vmem:[%s5217_s1 + $0x120] sm:$0xff] }
 0x391   :  { %v3547_v34 = vpop.eup %3546  ;;  %3209 = vmatpush3.bf16.msra.mxu0 %v3208_v16 }
 0x392   :  { %v3210_v56 = vpack.c.bf16 %v3545_v43, %v3547_v34  ;;  %v3713_v43 = vld [vmem:[%s5217_s1 + $0x128] sm:$0xff]  ;;  %v3714_v34 = vld [vmem:[%s5217_s1 + $0x130] sm:$0xff] }
 0x394   :  { %3211 = vmatprep.subr.bf16.mxu0 %v3210_v56  ;;  %v3715_v56 = vld [vmem:[%s5217_s1 + $0x138] sm:$0xff] }
 0x395   :  { %3213 = vmatpush3.bf16.msra.mxu0 %v3212_v20  ;;  %v3681_v20 = vld [vmem:[%s5217_s1 + $0x28] sm:$0xff] }
 0x398   :  { %1509 = vmatmul.mubr.f32.vlgmr.msra.gmra.mrb[46].mxu0 %v4476_v30 }
 0x399   :  { %1513 = vmatprep.mubr.f32.mxu0 %v4481_v41 }
 0x39c   :  { %1514 = vmatmul.mubr.f32.gmra.mrb[48].mxu0 %v4488_v33 }
 0x39d   :  { %2982 = vmatprep.mubr.msk.f32.mxu0 %vm112_vm0, %v3676_v62  ;;  %v3716_v62 = vld [vmem:[%s5217_s1 + $0x140] sm:$0xff] }
 0x42b   :  { %v2585_v2 = vpop.f32.mrb[42].mxu0 }
 0x42c   :  { %v2586_v25 = vpop.f32.mrb[43].mxu0 }
 0x42d   :  { %v2587_v45 = vadd.f32 %v2586_v25, %v2585_v2  ;;  %v3717_v2 = vld [vmem:[%s5217_s1 + $0x148] sm:$0xff]  ;;  %v3718_v25 = vld [vmem:[%s5217_s1 + $0x150] sm:$0xff] }
 0x42f   :  { %v2588_v46 = vpop.f32.mrb[44].mxu0  ;;  %v1436_v30 = vadd.f32 %v2587_v45, %v4493_v47  ;;  %v3719_v45 = vld [vmem:[%s5217_s1 + $0x158] sm:$0xff] }
 0x430   :  { %v2589_v52 = vpop.f32.mrb[45].mxu0 }
 0x431   :  { %v2590_v58 = vadd.f32 %v2589_v52, %v2588_v46  ;;  %v3720_v46 = vld [vmem:[%s5217_s1 + $0x160] sm:$0xff]  ;;  %v3721_v52 = vld [vmem:[%s5217_s1 + $0x168] sm:$0xff] }
 0x433   :  { %v1441_v1 = vadd.f32 %v2590_v58, %v4496_v5  ;;  %v3722_v58 = vld [vmem:[%s5217_s1 + $0x170] sm:$0xff] }
 0x46b   :  { %v2623_v38 = vpop.f32.mrb[46].mxu0 }
 0x46c   :  { %v2624_v44 = vpop.f32.mrb[47].mxu0 }
 0x46d   :  { %v2625_v17 = vadd.f32 %v2624_v44, %v2623_v38  ;;  %v3723_v38 = vld [vmem:[%s5217_s1 + $0x178] sm:$0xff]  ;;  %v3724_v44 = vld [vmem:[%s5217_s1 + $0x180] sm:$0xff] }
 0x46f   :  { %v1511_v41 = vadd.f32 %v2625_v17, %v1436_v30  ;;  %v2626_v0 = vpop.f32.mrb[48].mxu0  ;;  %v3725_v30 = vld [vmem:[%s5217_s1 + $0x188] sm:$0xff]  ;;  %v3726_v17 = vld [vmem:[%s5217_s1 + $0x190] sm:$0xff] }
 0x470   :  { %v2627_v33 = vpop.f32.mrb[49].mxu0 }
 0x471   :  { %v1519_v6 = vadd.f32 %v1511_v41, %v4501_v10  ;;  %v2628_v7 = vadd.f32 %v2627_v33, %v2626_v0  ;;  %v3678_v10 = vld [vmem:[%s5217_s1 + $0x10] sm:$0xff]  ;;  %v3727_v41 = vld [vmem:[%s5217_s1 + $0x198] sm:$0xff]  ;;  %v3728_v0 = vld [vmem:[%s5217_s1 + $0x1a0] sm:$0xff] }
 0x472   :  { %v3729_v33 = vld [vmem:[%s5217_s1 + $0x1a8] sm:$0xff] }
 0x473   :  { %v1521_v11 = vmul.f32 0.5, %v1519_v6  ;;  %v1516_v12 = vadd.f32 %v2628_v7, %v1441_v1  ;;  %v3730_v1 = vld [vmem:[%s5217_s1 + $0x1b0] sm:$0xff]  ;;  %v3731_v6 = vld [vmem:[%s5217_s1 + $0x1b8] sm:$0xff]  ;;  %v3732_v7 = vld [vmem:[%s5217_s1 + $0x1c0] sm:$0xff] }
 0x475   :  { %v1520_v15 = vadd.f32 %v1516_v12, %v4503_v50  ;;  %v3679_v50 = vld [vmem:[%s5217_s1 + $0x18] sm:$0xff]  ;;  %v3734_v12 = vld [vmem:[%s5217_s1 + $0x1d0] sm:$0xff] }
 0x477   :  { %v1522_v16 = vmul.f32 0.5, %v1520_v15  ;;  %v3735_v15 = vld [vmem:[%s5217_s1 + $0x1d8] sm:$0xff] }
 0x479   :  { %v3214_v23 = vpack.c.bf16 %v1522_v16, %v1521_v11  ;;  %v3733_v11 = vld [vmem:[%s5217_s1 + $0x1c8] sm:$0xff]  ;;  %v3736_v16 = vld [vmem:[%s5217_s1 + $0x1e0] sm:$0xff] }
 0x47b   :  { %3215 = vmatprep.subr.bf16.mxu0 %v3214_v23 }
 0x47c   :  { %3217 = vmatpush3.bf16.msra.mxu0 %v3214_v23  ;;  %v3737_v23 = vld [vmem:[%s5217_s1 + $0x1e8] sm:$0xff] }
 0x47d   :  { %2980 = vmatprep.subr.msk.mxu0 %vm305_vm1, %v1527_v24 }
 0x480   :  { %2981 = vmatpush3.msk.msra.mxu0 %vm305_vm1, %v1527_v24  ;;  %v3738_v24 = vld [vmem:[%s5217_s1 + $0x1f0] sm:$0xff] }
 0x481   :  { %2983 = vmatmul.mubr.msk.f32.vlgmr.msra.gmra.mrb[50].mxu0 %vm112_vm0, %v3677_v32  ;;  %v3739_v32 = vld [vmem:[%s5217_s1 + $0x1f8] sm:$0xff] }
 0x482   :  { %2985 = vmatprep.mubr.msk.f32.mxu0 %vm112_vm0, %v3678_v10 }
 0x485   :  { %2986 = vmatmul.mubr.msk.f32.gmra.mrb[52].mxu0 %vm112_vm0, %v3679_v50 }
 0x486   :  { %2988 = vmatprep.mubr.msk.f32.mxu0 %vm112_vm0, %v3680_v19 }
 0x489   :  { %2989 = vmatmul.mubr.msk.f32.gmra.mrb[54].mxu0 %vm112_vm0, %v3681_v20 }
 0x48a   :  { %2991 = vmatprep.mubr.msk.f32.mxu0 %vm112_vm0, %v3682_v27 }
 0x48d   :  { %2992 = vmatmul.mubr.msk.f32.gmra.mrb[56].mxu0 %vm112_vm0, %v3683_v21 }
 0x48e   :  { %2994 = vmatprep.mubr.msk.f32.mxu0 %vm112_vm0, %v3684_v42 }
 0x491   :  { %2995 = vmatmul.mubr.msk.f32.gmra.mrb[58].mxu0 %vm112_vm0, %v3685_v28 }
 0x492   :  { %2997 = vmatprep.mubr.msk.f32.mxu0 %vm112_vm0, %v3686_v31 }
 0x495   :  { %2998 = vmatmul.mubr.msk.f32.gmra.mrb[60].mxu0 %vm112_vm0, %v3687_v35 }
 0x496   :  { %3000 = vmatprep.mubr.msk.f32.mxu0 %vm112_vm0, %v3688_v51 }
 0x499   :  { %3001 = vmatmul.mubr.msk.f32.gmra.mrb[62].mxu0 %vm112_vm0, %v3689_v54 }
 0x49a   :  { %3003 = vmatprep.mubr.msk.f32.mxu0 %vm112_vm0, %v3690_v14 }
 0x49d   :  { %3004 = vmatmul.mubr.msk.f32.gmra.mrb[64].mxu0 %vm112_vm0, %v3691_v49 }
 0x49e   :  { %3006 = vmatprep.mubr.msk.f32.mxu0 %vm112_vm0, %v3692_v3 }
 0x4a1   :  { %3007 = vmatmul.mubr.msk.f32.gmra.mrb[66].mxu0 %vm112_vm0, %v3693_v57 }
 0x4a2   :  { %3009 = vmatprep.mubr.msk.f32.mxu0 %vm112_vm0, %v3694_v59 }
 0x4a5   :  { %3010 = vmatmul.mubr.msk.f32.gmra.mrb[68].mxu0 %vm112_vm0, %v3695_v9 }
 0x4a6   :  { %3012 = vmatprep.mubr.msk.f32.mxu0 %vm112_vm0, %v3696_v36 }
 0x4a9   :  { %3013 = vmatmul.mubr.msk.f32.gmra.mrb[70].mxu0 %vm112_vm0, %v3697_v8 }
 0x4aa   :  { %3015 = vmatprep.mubr.msk.f32.mxu0 %vm112_vm0, %v3698_v61 }
 0x4ad   :  { %3016 = vmatmul.mubr.msk.f32.gmra.mrb[72].mxu0 %vm112_vm0, %v3699_v18 }
 0x4ae   :  { %3018 = vmatprep.mubr.msk.f32.mxu0 %vm112_vm0, %v3700_v63 }
 0x4b1   :  { %3019 = vmatmul.mubr.msk.f32.gmra.mrb[74].mxu0 %vm112_vm0, %v3701_v4 }
 0x4b2   :  { %3021 = vmatprep.mubr.msk.f32.mxu0 %vm112_vm0, %v3702_v40 }
 0x4b5   :  { %3022 = vmatmul.mubr.msk.f32.gmra.mrb[76].mxu0 %vm112_vm0, %v3703_v29 }
 0x4b6   :  { %3024 = vmatprep.mubr.msk.f32.mxu0 %vm112_vm0, %v3704_v37 }
 0x4b9   :  { %3025 = vmatmul.mubr.msk.f32.gmra.mrb[78].mxu0 %vm112_vm0, %v3705_v55 }
 0x4ba   :  { %3027 = vmatprep.mubr.msk.f32.mxu0 %vm112_vm0, %v3706_v53 }
 0x4bd   :  { %3028 = vmatmul.mubr.msk.f32.gmra.mrb[80].mxu0 %vm112_vm0, %v3707_v26 }
 0x4be   :  { %3030 = vmatprep.mubr.msk.f32.mxu0 %vm112_vm0, %v3708_v48 }
 0x4c1   :  { %3031 = vmatmul.mubr.msk.f32.gmra.mrb[82].mxu0 %vm112_vm0, %v3709_v22 }
 0x4c2   :  { %3033 = vmatprep.mubr.msk.f32.mxu0 %vm112_vm0, %v3710_v39 }
 0x4c5   :  { %3034 = vmatmul.mubr.msk.f32.gmra.mrb[84].mxu0 %vm112_vm0, %v3711_v60 }
 0x4c6   :  { %3036 = vmatprep.mubr.msk.f32.mxu0 %vm112_vm0, %v3712_v13 }
 0x4c9   :  { %3037 = vmatmul.mubr.msk.f32.gmra.mrb[86].mxu0 %vm112_vm0, %v3713_v43 }
 0x4ca   :  { %3039 = vmatprep.mubr.msk.f32.mxu0 %vm112_vm0, %v3714_v34 }
 0x4cd   :  { %3040 = vmatmul.mubr.msk.f32.gmra.mrb[88].mxu0 %vm112_vm0, %v3715_v56 }
 0x4ce   :  { %3042 = vmatprep.mubr.msk.f32.mxu0 %vm112_vm0, %v3716_v62 }
 0x4d1   :  { %3043 = vmatmul.mubr.msk.f32.gmra.mrb[90].mxu0 %vm112_vm0, %v3717_v2 }
 0x4d2   :  { %3045 = vmatprep.mubr.msk.f32.mxu0 %vm112_vm0, %v3718_v25 }
 0x4d5   :  { %3046 = vmatmul.mubr.msk.f32.gmra.mrb[92].mxu0 %vm112_vm0, %v3719_v45 }
 0x4d6   :  { %3048 = vmatprep.mubr.msk.f32.mxu0 %vm112_vm0, %v3720_v46 }
 0x4d9   :  { %3049 = vmatmul.mubr.msk.f32.gmra.mrb[94].mxu0 %vm112_vm0, %v3721_v52 }
 0x4da   :  { %3051 = vmatprep.mubr.msk.f32.mxu0 %vm112_vm0, %v3722_v58 }
 0x4dd   :  { %3052 = vmatmul.mubr.msk.f32.gmra.mrb[96].mxu0 %vm112_vm0, %v3723_v38 }
 0x4de   :  { %3054 = vmatprep.mubr.msk.f32.mxu0 %vm112_vm0, %v3724_v44 }
 0x4e1   :  { %3055 = vmatmul.mubr.msk.f32.gmra.mrb[98].mxu0 %vm112_vm0, %v3725_v30 }
 0x4e2   :  { %3057 = vmatprep.mubr.msk.f32.mxu0 %vm112_vm0, %v3726_v17 }
 0x4e5   :  { %3058 = vmatmul.mubr.msk.f32.gmra.mrb[100].mxu0 %vm112_vm0, %v3727_v41 }
 0x4e6   :  { %3060 = vmatprep.mubr.msk.f32.mxu0 %vm112_vm0, %v3728_v0 }
 0x4e9   :  { %3061 = vmatmul.mubr.msk.f32.gmra.mrb[102].mxu0 %vm112_vm0, %v3729_v33 }
 0x4ea   :  { %3063 = vmatprep.mubr.msk.f32.mxu0 %vm112_vm0, %v3730_v1 }
 0x4ed   :  { %3064 = vmatmul.mubr.msk.f32.gmra.mrb[104].mxu0 %vm112_vm0, %v3731_v6 }
 0x4ee   :  { %3066 = vmatprep.mubr.msk.f32.mxu0 %vm112_vm0, %v3732_v7 }
 0x4f1   :  { %3067 = vmatmul.mubr.msk.f32.gmra.mrb[106].mxu0 %vm112_vm0, %v3733_v11 }
 0x4f2   :  { %3069 = vmatprep.mubr.msk.f32.mxu0 %vm112_vm0, %v3734_v12 }
 0x4f5   :  { %3070 = vmatmul.mubr.msk.f32.gmra.mrb[108].mxu0 %vm112_vm0, %v3735_v15 }
 0x4f6   :  { %3072 = vmatprep.mubr.msk.f32.mxu0 %vm112_vm0, %v3736_v16 }
 0x4f9   :  { %3073 = vmatmul.mubr.msk.f32.gmra.mrb[110].mxu0 %vm112_vm0, %v3737_v23 }
 0x4fa   :  { %3075 = vmatprep.mubr.msk.f32.mxu0 %vm112_vm0, %v3738_v24 }
 0x4fd   :  { %3076 = vmatmul.mubr.msk.f32.gmra.mrb[112].mxu0 %vm112_vm0, %v3739_v32 }
 0x554   :  { %v2984_v10 = vpop.f32.mrb[50].mxu0 }
 0x555   :  { %3548 = vtanh.f32 %v2984_v10  ;;  %v1597_v50 = vpop.f32.mrb[51].mxu0 }
 0x556   :  { %3550 = vtanh.f32 %v1597_v50 }
 0x558   :  { %v2987_v19 = vpop.f32.mrb[52].mxu0 }
 0x559   :  { %3552 = vtanh.f32 %v2987_v19  ;;  %v1607_v20 = vpop.f32.mrb[53].mxu0 }
 0x55a   :  { %3554 = vtanh.f32 %v1607_v20 }
 0x55c   :  { %v2990_v27 = vpop.f32.mrb[54].mxu0 }
 0x55d   :  { %3556 = vtanh.f32 %v2990_v27  ;;  %v1617_v21 = vpop.f32.mrb[55].mxu0 }
 0x55e   :  { %3558 = vtanh.f32 %v1617_v21 }
 0x55f   :  { %v5043_v42 = vpop.eup %3548 }
 0x560   :  { %v5045_v28 = vpop.eup %3550  ;;  %v2993_v31 = vpop.f32.mrb[56].mxu0 }
 0x561   :  { %3560 = vtanh.f32 %v2993_v31  ;;  %v1627_v35 = vpop.f32.mrb[57].mxu0  ;;  %v3220_v51 = vpack.c.bf16 %v5043_v42, %v5045_v28 }
 0x562   :  { %3562 = vtanh.f32 %v1627_v35 }
 0x563   :  { %v5049_v54 = vpop.eup %3552 }
 0x564   :  { %v5051_v14 = vpop.eup %3554  ;;  %v2996_v49 = vpop.f32.mrb[58].mxu0 }
 0x565   :  { %3564 = vtanh.f32 %v2996_v49  ;;  %v1637_v3 = vpop.f32.mrb[59].mxu0  ;;  %v3224_v57 = vpack.c.bf16 %v5049_v54, %v5051_v14 }
 0x566   :  { %3566 = vtanh.f32 %v1637_v3 }
 0x567   :  { %v5055_v59 = vpop.eup %3556 }
 0x568   :  { %v5057_v9 = vpop.eup %3558  ;;  %v2999_v36 = vpop.f32.mrb[60].mxu0 }
 0x569   :  { %3568 = vtanh.f32 %v2999_v36  ;;  %v1647_v8 = vpop.f32.mrb[61].mxu0  ;;  %v3228_v61 = vpack.c.bf16 %v5055_v59, %v5057_v9 }
 0x56a   :  { %3570 = vtanh.f32 %v1647_v8 }
 0x56b   :  { %v5061_v18 = vpop.eup %3560 }
 0x56c   :  { %v5063_v63 = vpop.eup %3562  ;;  %v3002_v4 = vpop.f32.mrb[62].mxu0 }
 0x56d   :  { %3572 = vtanh.f32 %v3002_v4  ;;  %v1657_v40 = vpop.f32.mrb[63].mxu0  ;;  %v3232_v29 = vpack.c.bf16 %v5061_v18, %v5063_v63 }
 0x56e   :  { %3574 = vtanh.f32 %v1657_v40 }
 0x56f   :  { %v5067_v37 = vpop.eup %3564 }
 0x570   :  { %v5069_v55 = vpop.eup %3566  ;;  %v3005_v53 = vpop.f32.mrb[64].mxu0 }
 0x571   :  { %3576 = vtanh.f32 %v3005_v53  ;;  %v1667_v26 = vpop.f32.mrb[65].mxu0  ;;  %v3236_v48 = vpack.c.bf16 %v5067_v37, %v5069_v55 }
 0x572   :  { %3578 = vtanh.f32 %v1667_v26 }
 0x573   :  { %v5073_v22 = vpop.eup %3568 }
 0x574   :  { %v5075_v39 = vpop.eup %3570  ;;  %v3008_v60 = vpop.f32.mrb[66].mxu0 }
 0x575   :  { %3580 = vtanh.f32 %v3008_v60  ;;  %v1677_v13 = vpop.f32.mrb[67].mxu0  ;;  %v3240_v43 = vpack.c.bf16 %v5073_v22, %v5075_v39  ;;  %v3741_v39 = vld [vmem:[%s5218_s2 + $0x28] sm:$0xff] }
 0x576   :  { %3582 = vtanh.f32 %v1677_v13 }
 0x577   :  { %v5079_v34 = vpop.eup %3572 }
 0x578   :  { %v5081_v56 = vpop.eup %3574  ;;  %v3011_v62 = vpop.f32.mrb[68].mxu0 }
 0x579   :  { %3584 = vtanh.f32 %v3011_v62  ;;  %v1687_v2 = vpop.f32.mrb[69].mxu0  ;;  %v3244_v25 = vpack.c.bf16 %v5079_v34, %v5081_v56  ;;  %v3742_v56 = vld [vmem:[%s5218_s2 + $0x20] sm:$0xff] }
 0x57a   :  { %3586 = vtanh.f32 %v1687_v2 }
 0x57b   :  { %v5085_v45 = vpop.eup %3576 }
 0x57c   :  { %v5087_v46 = vpop.eup %3578  ;;  %v3014_v52 = vpop.f32.mrb[70].mxu0 }
 0x57d   :  { %3588 = vtanh.f32 %v3014_v52  ;;  %v1697_v58 = vpop.f32.mrb[71].mxu0  ;;  %v3248_v38 = vpack.c.bf16 %v5085_v45, %v5087_v46 }
 0x57e   :  { %3590 = vtanh.f32 %v1697_v58 }
 0x57f   :  { %v3581_v44 = vpop.eup %3580 }
 0x580   :  { %v3583_v30 = vpop.eup %3582  ;;  %v3017_v17 = vpop.f32.mrb[72].mxu0 }
 0x581   :  { %3592 = vtanh.f32 %v3017_v17  ;;  %v1707_v41 = vpop.f32.mrb[73].mxu0  ;;  %v3218_v0 = vpack.c.bf16 %v3581_v44, %v3583_v30 }
 0x582   :  { %3594 = vtanh.f32 %v1707_v41 }
 0x583   :  { %v3585_v33 = vpop.eup %3584  ;;  %3219 = vmatprep.subr.bf16.mxu1 %v3218_v0 }
 0x584   :  { %v3587_v1 = vpop.eup %3586  ;;  %v3020_v6 = vpop.f32.mrb[74].mxu0  ;;  %3221 = vmatpush3.bf16.msra.mxu1 %v3220_v51 }
 0x585   :  { %3596 = vtanh.f32 %v3020_v6  ;;  %v1717_v7 = vpop.f32.mrb[75].mxu0  ;;  %v3222_v11 = vpack.c.bf16 %v3585_v33, %v3587_v1 }
 0x586   :  { %3598 = vtanh.f32 %v1717_v7 }
 0x587   :  { %v3589_v12 = vpop.eup %3588  ;;  %3223 = vmatprep.subr.bf16.mxu1 %v3222_v11 }
 0x588   :  { %v3591_v15 = vpop.eup %3590  ;;  %v3023_v16 = vpop.f32.mrb[76].mxu0  ;;  %3225 = vmatpush3.bf16.msra.mxu1 %v3224_v57 }
 0x589   :  { %3600 = vtanh.f32 %v3023_v16  ;;  %v1727_v23 = vpop.f32.mrb[77].mxu0  ;;  %v3226_v24 = vpack.c.bf16 %v3589_v12, %v3591_v15 }
 0x58a   :  { %3602 = vtanh.f32 %v1727_v23 }
 0x58b   :  { %v3593_v32 = vpop.eup %3592  ;;  %3227 = vmatprep.subr.bf16.mxu1 %v3226_v24 }
 0x58c   :  { %v3595_v10 = vpop.eup %3594  ;;  %v3026_v50 = vpop.f32.mrb[78].mxu0  ;;  %3229 = vmatpush3.bf16.msra.mxu1 %v3228_v61 }
 0x58d   :  { %3604 = vtanh.f32 %v3026_v50  ;;  %v1737_v19 = vpop.f32.mrb[79].mxu0  ;;  %v3230_v20 = vpack.c.bf16 %v3593_v32, %v3595_v10 }
 0x58e   :  { %3606 = vtanh.f32 %v1737_v19 }
 0x58f   :  { %v3597_v27 = vpop.eup %3596  ;;  %3231 = vmatprep.subr.bf16.mxu1 %v3230_v20 }
 0x590   :  { %v3599_v21 = vpop.eup %3598  ;;  %v3029_v42 = vpop.f32.mrb[80].mxu0  ;;  %3233 = vmatpush3.bf16.msra.mxu1 %v3232_v29 }
 0x591   :  { %3608 = vtanh.f32 %v3029_v42  ;;  %v1747_v28 = vpop.f32.mrb[81].mxu0  ;;  %v3234_v31 = vpack.c.bf16 %v3597_v27, %v3599_v21 }
 0x592   :  { %3610 = vtanh.f32 %v1747_v28 }
 0x593   :  { %v3601_v35 = vpop.eup %3600  ;;  %3235 = vmatprep.subr.bf16.mxu1 %v3234_v31 }
 0x594   :  { %v3603_v51 = vpop.eup %3602  ;;  %3237 = vmatpush3.bf16.msra.mxu1 %v3236_v48  ;;  %v3032_v54 = vpop.f32.mrb[82].mxu0  ;;  %v3740_v48 = vld [vmem:[%s5218_s2] sm:$0xff] }
 0x595   :  { %v3238_v14 = vpack.c.bf16 %v3601_v35, %v3603_v51  ;;  %3612 = vtanh.f32 %v3032_v54  ;;  %v1757_v49 = vpop.f32.mrb[83].mxu0 }
 0x596   :  { %3614 = vtanh.f32 %v1757_v49 }
 0x597   :  { %v3605_v3 = vpop.eup %3604  ;;  %3239 = vmatprep.subr.bf16.mxu1 %v3238_v14 }
 0x598   :  { %v3607_v57 = vpop.eup %3606  ;;  %3241 = vmatpush3.bf16.msra.mxu1 %v3240_v43  ;;  %v3035_v59 = vpop.f32.mrb[84].mxu0 }
 0x599   :  { %v3242_v9 = vpack.c.bf16 %v3605_v3, %v3607_v57  ;;  %3616 = vtanh.f32 %v3035_v59  ;;  %v1767_v36 = vpop.f32.mrb[85].mxu0 }
 0x59a   :  { %3618 = vtanh.f32 %v1767_v36 }
 0x59b   :  { %v3609_v8 = vpop.eup %3608  ;;  %3243 = vmatprep.subr.bf16.mxu1 %v3242_v9 }
 0x59c   :  { %v3611_v61 = vpop.eup %3610  ;;  %3245 = vmatpush3.bf16.msra.mxu1 %v3244_v25  ;;  %v3038_v18 = vpop.f32.mrb[86].mxu0  ;;  %v3743_v25 = vld [vmem:[%s5218_s2 + $0x18] sm:$0xff] }
 0x59d   :  { %v3246_v63 = vpack.c.bf16 %v3609_v8, %v3611_v61  ;;  %3620 = vtanh.f32 %v3038_v18  ;;  %v1777_v4 = vpop.f32.mrb[87].mxu0 }
 0x59e   :  { %3622 = vtanh.f32 %v1777_v4 }
 0x59f   :  { %v5109_v40 = vpop.eup %3612  ;;  %3247 = vmatprep.subr.bf16.mxu1 %v3246_v63 }
 0x5a0   :  { %v5111_v29 = vpop.eup %3614  ;;  %3249 = vmatpush3.bf16.msra.mxu1 %v3248_v38  ;;  %v3041_v37 = vpop.f32.mrb[88].mxu0 }
 0x5a1   :  { %3624 = vtanh.f32 %v3041_v37  ;;  %v1787_v55 = vpop.f32.mrb[89].mxu0  ;;  %v3252_v53 = vpack.c.bf16 %v5109_v40, %v5111_v29 }
 0x5a2   :  { %3626 = vtanh.f32 %v1787_v55 }
 0x5a3   :  { %v5118_v26 = vpop.eup %3616  ;;  %2045 = vmatmul.mubr.f32.vlgmr.msra.gmra.mrb[94].mxu1 %v3740_v48 }
 0x5a4   :  { %v5123_v22 = vpop.eup %3618  ;;  %2049 = vmatprep.mubr.f32.mxu1 %v3741_v39  ;;  %v3044_v60 = vpop.f32.mrb[90].mxu0 }
 0x5a5   :  { %3628 = vtanh.f32 %v3044_v60  ;;  %v1797_v13 = vpop.f32.mrb[91].mxu0  ;;  %v3256_v43 = vpack.c.bf16 %v5118_v26, %v5123_v22 }
 0x5a6   :  { %3630 = vtanh.f32 %v1797_v13 }
 0x5a7   :  { %v5130_v34 = vpop.eup %3620  ;;  %2050 = vmatmul.mubr.f32.gmra.mrb[96].mxu1 %v3742_v56 }
 0x5a8   :  { %v5135_v62 = vpop.eup %3622  ;;  %v3047_v2 = vpop.f32.mrb[92].mxu0  ;;  %2119 = vmatprep.mubr.f32.mxu1 %v3743_v25  ;;  %v3744_v25 = vld [vmem:[%s5218_s2 + $0x10] sm:$0xff] }
 0x5a9   :  { %3632 = vtanh.f32 %v3047_v2  ;;  %v1807_v45 = vpop.f32.mrb[93].mxu0  ;;  %v3260_v46 = vpack.c.bf16 %v5130_v34, %v5135_v62 }
 0x5aa   :  { %3634 = vtanh.f32 %v1807_v45  ;;  %v3745_v45 = vld [vmem:[%s5218_s2 + $0x38] sm:$0xff] }
 0x5ab   :  { %v5142_v52 = vpop.eup %3624 }
 0x5ac   :  { %v5144_v58 = vpop.eup %3626  ;;  %v3050_v38 = vpop.f32.mrb[94].mxu0 }
 0x5ad   :  { %3636 = vtanh.f32 %v3050_v38  ;;  %v1817_v44 = vpop.f32.mrb[95].mxu0  ;;  %v3264_v30 = vpack.c.bf16 %v5142_v52, %v5144_v58 }
 0x5ae   :  { %3638 = vtanh.f32 %v1817_v44 }
 0x5af   :  { %v5148_v17 = vpop.eup %3628 }
 0x5b0   :  { %v5150_v41 = vpop.eup %3630  ;;  %v3053_v0 = vpop.f32.mrb[96].mxu0 }
 0x5b1   :  { %3640 = vtanh.f32 %v3053_v0  ;;  %v1827_v33 = vpop.f32.mrb[97].mxu0  ;;  %v3268_v1 = vpack.c.bf16 %v5148_v17, %v5150_v41 }
 0x5b2   :  { %3642 = vtanh.f32 %v1827_v33 }
 0x5b3   :  { %v5154_v6 = vpop.eup %3632 }
 0x5b4   :  { %v5156_v7 = vpop.eup %3634  ;;  %v3056_v11 = vpop.f32.mrb[98].mxu0 }
 0x5b5   :  { %3644 = vtanh.f32 %v3056_v11  ;;  %v1837_v12 = vpop.f32.mrb[99].mxu0  ;;  %v3272_v15 = vpack.c.bf16 %v5154_v6, %v5156_v7 }
 0x5b6   :  { %3646 = vtanh.f32 %v1837_v12 }
 0x5b7   :  { %v5160_v16 = vpop.eup %3636 }
 0x5b8   :  { %v5162_v23 = vpop.eup %3638  ;;  %v3059_v24 = vpop.f32.mrb[100].mxu0 }
 0x5b9   :  { %3648 = vtanh.f32 %v3059_v24  ;;  %v1847_v32 = vpop.f32.mrb[101].mxu0  ;;  %v3276_v10 = vpack.c.bf16 %v5160_v16, %v5162_v23 }
 0x5ba   :  { %3650 = vtanh.f32 %v1847_v32 }
 0x5bb   :  { %v5166_v50 = vpop.eup %3640 }
 0x5bc   :  { %v5168_v19 = vpop.eup %3642  ;;  %v3062_v20 = vpop.f32.mrb[102].mxu0 }
 0x5bd   :  { %3652 = vtanh.f32 %v3062_v20  ;;  %v1857_v27 = vpop.f32.mrb[103].mxu0  ;;  %v3280_v21 = vpack.c.bf16 %v5166_v50, %v5168_v19 }
 0x5be   :  { %3654 = vtanh.f32 %v1857_v27 }
 0x5bf   :  { %v3645_v42 = vpop.eup %3644 }
 0x5c0   :  { %v3647_v28 = vpop.eup %3646  ;;  %v3065_v31 = vpop.f32.mrb[104].mxu0 }
 0x5c1   :  { %3656 = vtanh.f32 %v3065_v31  ;;  %v1867_v35 = vpop.f32.mrb[105].mxu0  ;;  %v3250_v51 = vpack.c.bf16 %v3645_v42, %v3647_v28 }
 0x5c2   :  { %3658 = vtanh.f32 %v1867_v35 }
 0x5c3   :  { %v3649_v54 = vpop.eup %3648  ;;  %3251 = vmatprep.subr.bf16.mxu1 %v3250_v51 }
 0x5c4   :  { %v3651_v14 = vpop.eup %3650  ;;  %v3068_v49 = vpop.f32.mrb[106].mxu0  ;;  %3253 = vmatpush3.bf16.msra.mxu1 %v3252_v53 }
 0x5c5   :  { %3660 = vtanh.f32 %v3068_v49  ;;  %v1877_v3 = vpop.f32.mrb[107].mxu0  ;;  %v3254_v57 = vpack.c.bf16 %v3649_v54, %v3651_v14 }
 0x5c6   :  { %3662 = vtanh.f32 %v1877_v3 }
 0x5c7   :  { %v3653_v59 = vpop.eup %3652  ;;  %3255 = vmatprep.subr.bf16.mxu1 %v3254_v57 }
 0x5c8   :  { %v3655_v9 = vpop.eup %3654  ;;  %v3071_v36 = vpop.f32.mrb[108].mxu0  ;;  %3257 = vmatpush3.bf16.msra.mxu1 %v3256_v43 }
 0x5c9   :  { %3664 = vtanh.f32 %v3071_v36  ;;  %v1887_v8 = vpop.f32.mrb[109].mxu0  ;;  %v3258_v61 = vpack.c.bf16 %v3653_v59, %v3655_v9 }
 0x5ca   :  { %3666 = vtanh.f32 %v1887_v8 }
 0x5cb   :  { %v3657_v18 = vpop.eup %3656  ;;  %3259 = vmatprep.subr.bf16.mxu1 %v3258_v61 }
 0x5cc   :  { %v3659_v63 = vpop.eup %3658  ;;  %v3074_v4 = vpop.f32.mrb[110].mxu0  ;;  %3261 = vmatpush3.bf16.msra.mxu1 %v3260_v46  ;;  %v3746_v46 = vld [vmem:[%s5218_s2 + $0x30] sm:$0xff]  ;;  %s3747_s2 = scalar_lea.vmem %s2138_s6, 256 }
 0x5cd   :  { %3668 = vtanh.f32 %v3074_v4  ;;  %v1897_v40 = vpop.f32.mrb[111].mxu0  ;;  %v3262_v29 = vpack.c.bf16 %v3657_v18, %v3659_v63  ;;  %p3748_p0 = scmp.ne.s32.totalorder %s2138_s6, %s3747_s2  ;;  %p3753_p2 = scmp.lt.s32.totalorder %s3747_s2, %s3747_s2 }
 0x5ce   :  { %3670 = vtanh.f32 %v1897_v40 }
 0x5cf   :  { %v3661_v37 = vpop.eup %3660  ;;  %3263 = vmatprep.subr.bf16.mxu1 %v3262_v29  ;;  %p3754_p3 = por %p3753_p2, %p3752_p1 }
 0x5d0   :  { %v3663_v55 = vpop.eup %3662  ;;  %v3077_v53 = vpop.f32.mrb[112].mxu0  ;;  %3265 = vmatpush3.bf16.msra.mxu1 %v3264_v30 }
 0x5d1   :  { %3672 = vtanh.f32 %v3077_v53  ;;  %v1907_v26 = vpop.f32.mrb[113].mxu0  ;;  %v3266_v48 = vpack.c.bf16 %v3661_v37, %v3663_v55  ;;  %p3755_p4 = pnand %p3754_p3, %p3748_p0 }
 0x5d2   :  { %3674 = vtanh.f32 %v1907_v26 }
 0x5d3   :  { %v3665_v22 = vpop.eup %3664  ;;  %3267 = vmatprep.subr.bf16.mxu1 %v3266_v48 }
 0x5d4   :  { %v3667_v39 = vpop.eup %3666  ;;  %3269 = vmatpush3.bf16.msra.mxu1 %v3268_v1 }
 0x5d5   :  { %v3270_v60 = vpack.c.bf16 %v3665_v22, %v3667_v39 }
 0x5d7   :  { %v3669_v13 = vpop.eup %3668  ;;  %3271 = vmatprep.subr.bf16.mxu1 %v3270_v60 }
 0x5d8   :  { %v3671_v43 = vpop.eup %3670  ;;  %3273 = vmatpush3.bf16.msra.mxu1 %v3272_v15 }
 0x5d9   :  { %v3274_v34 = vpack.c.bf16 %v3669_v13, %v3671_v43 }
 0x5db   :  { %v3673_v56 = vpop.eup %3672  ;;  %3275 = vmatprep.subr.bf16.mxu1 %v3274_v34 }
 0x5dc   :  { %v3675_v62 = vpop.eup %3674  ;;  %3277 = vmatpush3.bf16.msra.mxu1 %v3276_v10 }
 0x5dd   :  { %v3278_v2 = vpack.c.bf16 %v3673_v56, %v3675_v62 }
 0x5df   :  { %3279 = vmatprep.subr.bf16.mxu1 %v3278_v2 }
 0x5e0   :  { %3281 = vmatpush3.bf16.msra.mxu1 %v3280_v21 }
 0x5e3   :  { %2120 = vmatmul.mubr.f32.vlgmr.msra.gmra.mrb[98].mxu1 %v3744_v25 }
 0x5e4   :  { %2124 = vmatprep.mubr.f32.mxu1 %v3745_v45 }
 0x5e7   :  { %2125 = vmatmul.mubr.f32.gmra.mrb[100].mxu1 %v3746_v46 }
 0x676   :  { %v2728_v52 = vpop.f32.mrb[94].mxu1 }
 0x677   :  { %v2729_v58 = vpop.f32.mrb[95].mxu1 }
 0x678   :  { %v2730_v38 = vadd.f32 %v2729_v58, %v2728_v52 }
 0x67a   :  { %v2731_v44 = vpop.f32.mrb[96].mxu1  ;;  %v2047_v33 = vadd.f32 %v2730_v38, %v4493_v47 }
 0x67b   :  { %v2732_v30 = vpop.f32.mrb[97].mxu1 }
 0x67c   :  { %v2733_v17 = vadd.f32 %v2732_v30, %v2731_v44 }
 0x67e   :  { %v2052_v12 = vadd.f32 %v2733_v17, %v4496_v5 }
 0x6b6   :  { %v2766_v41 = vpop.f32.mrb[98].mxu1 }
 0x6b7   :  { %v2767_v0 = vpop.f32.mrb[99].mxu1 }
 0x6b8   :  { %v2768_v1 = vadd.f32 %v2767_v0, %v2766_v41 }
 0x6ba   :  { %v2122_v6 = vadd.f32 %v2768_v1, %v2047_v33  ;;  %v2769_v7 = vpop.f32.mrb[100].mxu1 }
 0x6bb   :  { %v2770_v11 = vpop.f32.mrb[101].mxu1 }
 0x6bc   :  { %2130 = vst [vmem:[#allocation3] sm:$0xff] %v2122_v6  ;;  %v2771_v15 = vadd.f32 %v2770_v11, %v2769_v7 }
 0x6be   :  { %v2127_v16 = vadd.f32 %v2771_v15, %v2052_v12 }
 0x6c0   :  { %2131 = vst [vmem:[#allocation3 + $0x8] sm:$0xff] %v2127_v16 }
 0x6c1   :  { %3758 = shalt.err (!%p3755_p4)
}
 0x6c2   :  { %s3759_s9 = scalar_lea.hbm %s5220_s4, 256 }
 0x6c3   :  { %p3760_p5 = scmp.ne.s32.totalorder %s5220_s4, %s3759_s9  ;;  %p3763_p6 = scmp.lt.u32.totalorder %s3759_s9, %s5220_s4 }
 0x6c5   :  { %p3765_p7 = pnand %p3763_p6, %p3760_p5 }
 0x6c7   :  { %3768 = shalt.err (!%p3765_p7)
}
 0x6c8   :  { %s3774_s14 = smov 128   ;;  %s3775_s15 = smov 8  }
 0x6c9   :  { %2143 = dma.vmem_to_hbm [thread:$0]  %s2138_s6, 256, %s5220_s4, [#allocation4], %s3774_s14, %s3774_s14, %s3775_s15  }
 0x6ca   :  { %3769 = dma.done.wait [#allocation4], 256  }
 0x6cb   :  { %3770 = vsyncadd [#allocation4], 4294967040 }
 0x6cc   :  { %2147 = vsyncpa [#allocation4], 1 }

</bundles_post_ra>
